<compile_context>
chip_gen: v6e
topology: v6e:2x2x1
jax: 0.10.0
libtpu: 0.0.40
codegen_flags: <defaults>
</compile_context>

<pallas_src>
import math
import numpy as np
import jax
import jax.numpy as jnp
from jax.experimental import pallas as pl
from jax.experimental.pallas import tpu as pltpu


# ----------------------------- Pallas kernel -------------------------------


def make_drn_seg_kernel(n_heads):
    """Fused heads + x8 bilinear upsample kernel.

    Per grid step (n, j):
      j == 0 : heads = Wf_pad @ f                       [Chp, H*W]     (MXU) -> scratch
      all j  : th_j  = heads  @ mh_colblock_j           [Chp, HoG*W]   (MXU)
               out_j = th_j   @ kron(I_HoG, Uw^T)       [Chp, HoG*Wout](MXU)
               write channels [0:n_heads] of out_j to the output block.
    """

    def kernel(f_ref, wf_ref, mh_ref, mw_ref, out_ref, heads_ref):
        j = pl.program_id(1)

        @pl.when(j == 0)
        def _():
            # Channel contraction 512 -> 16 (10 real heads + 6 zero pad rows),
            # computed once per batch element and kept resident in VMEM scratch.
            heads_ref[...] = jnp.dot(
                wf_ref[...], f_ref[0],
                preferred_element_type=jnp.float32).astype(heads_ref.dtype)

        # Height upsample of the j-th group of Hout rows: one full-width matmul.
        th_j = jnp.dot(heads_ref[...], mh_ref[...],
                       preferred_element_type=jnp.float32).astype(jnp.bfloat16)
        # Width upsample of the same row group: one full-width matmul.
        out_j = jnp.dot(th_j, mw_ref[...], preferred_element_type=jnp.float32)
        out_ref[0] = out_j[:n_heads, :].astype(out_ref.dtype)

    return kernel


# ------------------------------ glue / wrapper ------------------------------


def bilinear_upsample_matrix(n_in, stride=8):
    """Dense [n_in*stride, n_in] numpy matrix equivalent to the frozen bilinear
    ConvTranspose2d(kernel=2*stride, stride, padding=stride//2, bias=False)
    along one spatial axis. Entries are multiples of 1/(2*stride) -> exact bf16."""
    k = 2 * stride
    pad = stride // 2
    f = math.ceil(k / 2)
    c = (2 * f - 1 - f % 2) / (2.0 * f)
    g = np.array([1.0 - abs(i / f - c) for i in range(k)], dtype=np.float32)
    n_out = n_in * stride
    U = np.zeros((n_out, n_in), dtype=np.float32)
    for o in range(n_out):
        for i in range(n_in):
            kk = o + pad - stride * i
            if 0 <= kk < k:
                U[o, i] = g[kk]
    return U


def drn_seg_forward(feat_nchw, w1, w_seg, w_edge, w_ori, *,
                    stride=8, row_groups=8, out_dtype=jnp.float32):
    """feat_nchw: [N, 512, H, W] (output of the DRN base). Returns dict of NCHW arrays.

    out_dtype=jnp.bfloat16 halves the largest HBM stream (output writeback) if
    downstream consumers tolerate it; default f32 matches the PyTorch module."""
    N, Cin, H, W = feat_nchw.shape
    Cmid = w1.shape[0]                      # 256
    n_ori = w_ori.shape[0]                  # 8
    Ch = 1 + 1 + n_ori                      # seg + edge + ori = 10
    Chp = 16                                # padded to a full bf16 sublane tile
    assert Ch <= Chp
    HW = H * W
    Hout, Wout = H * stride, W * stride
    G = row_groups
    assert Hout % G == 0, "row_groups must divide Hout"
    HoG = Hout // G                         # output rows per grid step
    assert (HoG * W) % 128 == 0 and (HoG * Wout) % 128 == 0

    # Fold conv1x1 (512->256) with the three 1x1 heads into one [Chp, Cin] matrix
    # (exact: all four convs have bias=False and there is no BN / activation
    # between them in DRNSeg.forward), zero-padded to 16 rows for full tiles.
    whead = jnp.concatenate([w_seg.reshape(1, Cmid),
                             w_edge.reshape(1, Cmid),
                             w_ori.reshape(n_ori, Cmid)], axis=0)          # [Ch, Cmid]
    wf = jnp.dot(whead, w1.reshape(Cmid, Cin))                             # [Ch, Cin]
    wf = jnp.concatenate(
        [wf, jnp.zeros((Chp - Ch, Cin), wf.dtype)], axis=0).astype(jnp.bfloat16)

    # Separable bilinear deconv as structured matrices (trace-time numpy constants).
    #   height: th[c, ho*W + w]    = sum_h Uh[ho, h] * heads[c, h*W + w]
    #   width:  out[c, r*Wout + wo] = sum_w Uw[wo, w] * th[c, r*W + w]   (per row group)
    Uh = bilinear_upsample_matrix(H, stride)                               # [Hout, H]
    Uw = bilinear_upsample_matrix(W, stride)                               # [Wout, W]
    mh = jnp.asarray(np.kron(Uh.T, np.eye(W, dtype=np.float32)),
                     dtype=jnp.bfloat16)                                   # [H*W, Hout*W]
    mw = jnp.asarray(np.kron(np.eye(HoG, dtype=np.float32), Uw.T),
                     dtype=jnp.bfloat16)                                   # [HoG*W, HoG*Wout]

    # bf16 features: halves the biggest input HBM stream; NCHW kept, reshape is free.
    f = feat_nchw.reshape(N, Cin, HW).astype(jnp.bfloat16)

    flops = N * (2 * Chp * Cin * HW
                 + G * (2 * Chp * HW * (HoG * W)
                        + 2 * Chp * (HoG * W) * (HoG * Wout)))
    bytes_accessed = (N * Cin * HW * 2                       # bf16 feature read
                      + Chp * Cin * 2                        # fused weights
                      + N * HW * (Hout * W) * 2              # height matrix (streamed per n)
                      + (HoG * W) * (HoG * Wout) * 2         # width matrix (resident)
                      + N * Ch * Hout * Wout * np.dtype(out_dtype).itemsize)

    out = pl.pallas_call(
        make_drn_seg_kernel(Ch),
        out_shape=jax.ShapeDtypeStruct((N, Ch, Hout * Wout), out_dtype),
        grid_spec=pltpu.PrefetchScalarGridSpec(
            num_scalar_prefetch=0,
            grid=(N, G),
            in_specs=[
                # feature block re-fetched only when n changes (index ignores j)
                pl.BlockSpec((1, Cin, HW), lambda n, j: (n, 0, 0)),
                pl.BlockSpec((Chp, Cin), lambda n, j: (0, 0)),
                # j-th column block of the height-upsample matrix
                pl.BlockSpec((HW, HoG * W), lambda n, j: (0, j)),
                # width-upsample matrix is identical for every row group -> resident
                pl.BlockSpec((HoG * W, HoG * Wout), lambda n, j: (0, 0)),
            ],
            out_specs=pl.BlockSpec((1, Ch, HoG * Wout), lambda n, j: (n, 0, j)),
            scratch_shapes=[pltpu.VMEM((Chp, HW), jnp.bfloat16)]),
        compiler_params=pltpu.CompilerParams(
            dimension_semantics=("parallel", "arbitrary")),
        cost_estimate=pl.CostEstimate(flops=flops, transcendentals=0,
                                      bytes_accessed=bytes_accessed),
    )(f, wf, mh, mw)

    out = out.reshape(N, Ch, Hout, Wout)        # free reshape, already NCHW-ordered
    return {'seg': out[:, 0:1],
            'edge': out[:, 1:2],
            'orientation': out[:, 2:2 + n_ori]}


# --------------------------------- main -------------------------------------


if __name__ == "__main__":
    key = jax.random.PRNGKey(0)
    k1, k2, k3, k4, k5 = jax.random.split(key, 5)

    N, Cin, Cmid, H, W = 2, 512, 256, 16, 16

    # Deterministic parameter init mirroring DRNSeg.init_params:
    #   conv1x1: kaiming normal (fan_out = 256)    heads: normal(std=0.01)
    w1 = jax.random.normal(k1, (Cmid, Cin), jnp.float32) * math.sqrt(2.0 / Cmid)
    w_seg = jax.random.normal(k2, (1, Cmid), jnp.float32) * 0.01
    w_edge = jax.random.normal(k3, (1, Cmid), jnp.float32) * 0.01
    w_ori = jax.random.normal(k4, (8, Cmid), jnp.float32) * 0.01

    # Input: output of the DRN base (512 channels), NCHW like PyTorch.
    feat = jax.random.normal(k5, (N, Cin, H, W), jnp.float32)

    fwd = jax.jit(drn_seg_forward)
    out = fwd(feat, w1, w_seg, w_edge, w_ori)
    out = jax.tree_util.tree_map(jax.block_until_ready, out)

    # Pure-JAX f32 reference (unfused weights) for a correctness sanity check;
    # tolerance accounts for bf16 weights/activations in the kernel.
    x256 = jnp.einsum('nchw,oc->nohw', feat, w1)
    seg_r = jnp.einsum('nchw,oc->nohw', x256, w_seg)
    edge_r = jnp.einsum('nchw,oc->nohw', x256, w_edge)
    ori_r = jnp.einsum('nchw,oc->nohw', x256, w_ori)
    Uh_f = jnp.asarray(bilinear_upsample_matrix(H, 8))
    Uw_f = jnp.asarray(bilinear_upsample_matrix(W, 8))
    up = lambda z: jnp.einsum('ph,nchw,qw->ncpq', Uh_f, z, Uw_f)
    np.testing.assert_allclose(out['seg'], up(seg_r), rtol=5e-2, atol=1e-2)
    np.testing.assert_allclose(out['edge'], up(edge_r), rtol=5e-2, atol=1e-2)
    np.testing.assert_allclose(out['orientation'], up(ori_r), rtol=5e-2, atol=1e-2)

    assert out['seg'].shape == (N, 1, H * 8, W * 8)
    assert out['edge'].shape == (N, 1, H * 8, W * 8)
    assert out['orientation'].shape == (N, 8, H * 8, W * 8)

    print("KERNEL_OK")
</pallas_src>

<mosaic_0001>
module attributes {stable_mosaic.version = 11 : i64} {
  func.func @kernel(%arg0: i32, %arg1: i32, %arg2: memref<1x512x256xbf16, #tpu.memory_space<vmem>>, %arg3: memref<16x512xbf16, #tpu.memory_space<vmem>>, %arg4: memref<256x256xbf16, #tpu.memory_space<vmem>>, %arg5: memref<256x2048xbf16, #tpu.memory_space<vmem>>, %arg6: memref<1x10x2048xf32, #tpu.memory_space<vmem>>, %arg7: memref<16x256xbf16, #tpu.memory_space<vmem>>) attributes {dimension_semantics = [#tpu.dimension_semantics<parallel>, #tpu.dimension_semantics<arbitrary>], iteration_bounds = array<i64: 2, 8>, scalar_prefetch = 0 : i64, scratch_operands = 1 : i64, tpu.core_type = #tpu.core_type<tc>, window_params = [{transform_indices = @transform_0, window_bounds = array<i64: 1, 512, 256>}, {pipeline_mode = #tpu.pipeline_mode<synchronous>, transform_indices = @transform_1, window_bounds = array<i64: 16, 512>}, {transform_indices = @transform_2, window_bounds = array<i64: 256, 256>}, {pipeline_mode = #tpu.pipeline_mode<synchronous>, transform_indices = @transform_3, window_bounds = array<i64: 256, 2048>}, {transform_indices = @transform_4, window_bounds = array<i64: 1, 10, 2048>}]} {
    %c0_i32 = arith.constant 0 : i32
    %0 = arith.cmpi eq, %arg1, %c0_i32 : i32
    %1 = arith.extui %0 : i1 to i32
    %c0_i32_0 = arith.constant 0 : i32
    %2 = arith.cmpi ne, %1, %c0_i32_0 : i32
    scf.if %2 {
      %c0_10 = arith.constant 0 : index
      %c0_11 = arith.constant 0 : index
      %13 = vector.load %arg3[%c0_10, %c0_11] : memref<16x512xbf16, #tpu.memory_space<vmem>>, vector<16x512xbf16>
      %c0_12 = arith.constant 0 : index
      %c0_13 = arith.constant 0 : index
      %c0_14 = arith.constant 0 : index
      %14 = vector.load %arg2[%c0_12, %c0_13, %c0_14] : memref<1x512x256xbf16, #tpu.memory_space<vmem>>, vector<1x512x256xbf16>
      %15 = vector.shape_cast %14 : vector<1x512x256xbf16> to vector<512x256xbf16>
      %cst_15 = arith.constant dense<0.000000e+00> : vector<16x256xf32>
      %16 = tpu.matmul %13, %15, %cst_15 {dimension_numbers = #tpu.dot_dimension_numbers<[1], [0], [0], [1], [0, 0, 1, 1], [], []>} : vector<16x512xbf16>, vector<512x256xbf16>, vector<16x256xf32> -> vector<16x256xf32>
      %17 = arith.truncf %16 : vector<16x256xf32> to vector<16x256xbf16>
      %c0_16 = arith.constant 0 : index
      %c0_17 = arith.constant 0 : index
      %18 = vector.load %arg7[%c0_16, %c0_17] : memref<16x256xbf16, #tpu.memory_space<vmem>>, vector<16x256xbf16>
      tpu.vector_store %arg7[%c0_16, %c0_17], %17 {strides = array<i32>} : memref<16x256xbf16, #tpu.memory_space<vmem>>, vector<16x256xbf16>,
    } else {
    }
    %c0 = arith.constant 0 : index
    %c0_1 = arith.constant 0 : index
    %3 = vector.load %arg7[%c0, %c0_1] : memref<16x256xbf16, #tpu.memory_space<vmem>>, vector<16x256xbf16>
    %c0_2 = arith.constant 0 : index
    %c0_3 = arith.constant 0 : index
    %4 = vector.load %arg4[%c0_2, %c0_3] : memref<256x256xbf16, #tpu.memory_space<vmem>>, vector<256x256xbf16>
    %cst = arith.constant dense<0.000000e+00> : vector<16x256xf32>
    %5 = tpu.matmul %3, %4, %cst {dimension_numbers = #tpu.dot_dimension_numbers<[1], [0], [0], [1], [0, 0, 1, 1], [], []>} : vector<16x256xbf16>, vector<256x256xbf16>, vector<16x256xf32> -> vector<16x256xf32>
    %6 = arith.truncf %5 : vector<16x256xf32> to vector<16x256xbf16>
    %c0_4 = arith.constant 0 : index
    %c0_5 = arith.constant 0 : index
    %7 = vector.load %arg5[%c0_4, %c0_5] : memref<256x2048xbf16, #tpu.memory_space<vmem>>, vector<256x2048xbf16>
    %cst_6 = arith.constant dense<0.000000e+00> : vector<16x2048xf32>
    %8 = tpu.matmul %6, %7, %cst_6 {dimension_numbers = #tpu.dot_dimension_numbers<[1], [0], [0], [1], [0, 0, 1, 1], [], []>} : vector<16x256xbf16>, vector<256x2048xbf16>, vector<16x2048xf32> -> vector<16x2048xf32>
    %9 = vector.extract_strided_slice %8 {offsets = [0, 0], sizes = [10, 2048], strides = [1, 1]} : vector<16x2048xf32> to vector<10x2048xf32>
    %c0_7 = arith.constant 0 : index
    %c0_8 = arith.constant 0 : index
    %c0_9 = arith.constant 0 : index
    %10 = vector.load %arg6[%c0_7, %c0_8, %c0_9] : memref<1x10x2048xf32, #tpu.memory_space<vmem>>, vector<1x10x2048xf32>
    %11 = vector.shape_cast %10 : vector<1x10x2048xf32> to vector<10x2048xf32>
    %12 = vector.shape_cast %9 : vector<10x2048xf32> to vector<1x10x2048xf32>
    tpu.vector_store %arg6[%c0_7, %c0_8, %c0_9], %12 {strides = array<i32>} : memref<1x10x2048xf32, #tpu.memory_space<vmem>>, vector<1x10x2048xf32>,
    return
  }
  func.func @transform_0(%arg0: i32, %arg1: i32) -> (i32, i32, i32) {
    %c0_i32 = arith.constant 0 : i32
    %c0_i32_0 = arith.constant 0 : i32
    %c0_i32_1 = arith.constant 0 : i32
    return %arg0, %c0_i32, %c0_i32_0 : i32, i32, i32
  }
  func.func @transform_1(%arg0: i32, %arg1: i32) -> (i32, i32) {
    %c0_i32 = arith.constant 0 : i32
    %c0_i32_0 = arith.constant 0 : i32
    %c0_i32_1 = arith.constant 0 : i32
    return %c0_i32, %c0_i32_0 : i32, i32
  }
  func.func @transform_2(%arg0: i32, %arg1: i32) -> (i32, i32) {
    %c0_i32 = arith.constant 0 : i32
    %c0_i32_0 = arith.constant 0 : i32
    return %c0_i32, %arg1 : i32, i32
  }
  func.func @transform_3(%arg0: i32, %arg1: i32) -> (i32, i32) {
    %c0_i32 = arith.constant 0 : i32
    %c0_i32_0 = arith.constant 0 : i32
    %c0_i32_1 = arith.constant 0 : i32
    return %c0_i32, %c0_i32_0 : i32, i32
  }
  func.func @transform_4(%arg0: i32, %arg1: i32) -> (i32, i32, i32) {
    %c0_i32 = arith.constant 0 : i32
    %c0_i32_0 = arith.constant 0 : i32
    return %arg0, %c0_i32, %arg1 : i32, i32, i32
  }
}

</mosaic_0001>

<bundles_post_ra>
// kernel: drn_seg_forward.1
= control target key start
LH: loop header
LB: loop body
LE: loop exit
PB: predicated region body
PF: predicated region fallthrough
CT: control target
= control target key end

     0   :  { %s3940_s15 = smov 0   ;;  %s3942_s16 = smov 0   ;;  %s5132_s0 = inlined_call_operand.vmem [shape: bf16[2,512,256], index: 0, kind: input, shape index: {}]   ;;  %s5133_s1 = inlined_call_operand.vmem [shape: bf16[16,512], index: 1, kind: input, shape index: {}]   ;;  %s5134_s2 = inlined_call_operand.vmem [shape: bf16[256,2048], index: 2, kind: input, shape index: {}]   ;;  %s5135_s3 = inlined_call_operand.vmem [shape: bf16[256,2048], index: 3, kind: input, shape index: {}]   ;;  %s5136_s4 = inlined_call_operand.vmem [shape: f32[2,10,16384], index: 4, kind: output, shape index: {}]  }
   0x1   :  { %s3944_s17 = smov 0   ;;  %s3946_s18 = smov 0  }
   0x2   :  { %s3948_s19 = smov 0   ;;  %s3950_s20 = smov 0  }
   0x3   :  { %s3952_s21 = smov 0   ;;  %s3954_s22 = smov 0  }
   0x4   :  { %s3956_s23 = smov 0  }
   0x5 LB: > { %s3235_s24 = sadd.s32 4294967295, %s3913_s23   ;;  %s23_s25 = sadd.s32 1, %s3905_s21  ;;  %s3913_s23 = sphi %s3956_s23, %s14_s23   ;;  %s3909_s22 = sphi %s3954_s22, %s5145_s22   ;;  %s3905_s21 = sphi %s3952_s21, %s5144_s21   ;;  %s3901_s20 = sphi %s3950_s20, %s5143_s20   ;;  %s3897_s19 = sphi %s3948_s19, %s5142_s19   ;;  %s3893_s18 = sphi %s3946_s18, %s5141_s18   ;;  %s3889_s17 = sphi %s3944_s17, %s5140_s17   ;;  %s3885_s16 = sphi %s3942_s16, %s5139_s16   ;;  %s3881_s15 = sphi %s3940_s15, %s5138_s15  }
   0x6   : > { %p24_p0 = scmp.ge.s32.totalorder %s23_s25, 8  ;;  %s26_s26 = sadd.s32 1, %s3909_s22 }
   0x7   : > { %s80_s27 = sadd.s32 1, %s3893_s18  ;;  %p87_p1 = scmp.ne.s32.totalorder %s3893_s18, %s3889_s17 }
   0x8   : > { %s5147_s25 = smov (%p24_p0, %s23_s25), 0  ;;  %s5149_s26 = smov (!%p24_p0, %s26_s26), %s3909_s22 }
   0x9   : > { %s77_s28 = ssub.s32 %s3905_s21, %s5147_s25  ;;  %p88_p2 = scmp.eq.s32.totalorder %s3913_s23, 0 }
   0xa   : > { %p28_p3 = scmp.ge.s32.totalorder %s5149_s26, 2  ;;  %p78_p4 = scmp.eq.s32.totalorder %s77_s28, 0 }
   0xb   : > { %p89_p5 = por %p88_p2, %p87_p1  ;;  %s129_s29 = sadd.s32 1, %s3885_s16 }
   0xc   : > { %s5151_s26 = smov (%p28_p3, %s5149_s26), 0  ;;  %p139_p6 = scmp.ne.s32.totalorder %s3885_s16, %s3881_s15 }
   0xd   : > { %s4001_s30 = scalar_select %p78_p4, %s3893_s18, %s80_s27  }
   0xe   : > { %s124_s5 = ssub.s32 %s3909_s22, %s5151_s26  ;;  %p140_p7 = scmp.eq.s32.totalorder %s3235_s24, 15 }
   0xf   : > { %s126_s6 = sor.u32 %s124_s5, %s77_s28  ;;  %p3238_p10 = scmp.ge.s32.totalorder %s3913_s23, 16 }
  0x10   : > { %p127_p8 = scmp.eq.s32.totalorder %s126_s6, 0  ;;  %p4007_p9 = por %p140_p7, %p139_p6 }
  0x11   : > { %168 = sbr.rel (%p3238_p10) target bundleno = 58 (0x3a), region = 24 }
  0x12   : > { %s4012_s8 = scalar_select %p127_p8, %s3885_s16, %s129_s29  }
  0x16   : > { %179 = sbr.rel (!%p89_p5) target bundleno = 58 (0x3a), region = 32  ;;  %s181_s9 = sand.u32 (%p89_p5), 1, %s3893_s18  }
  0x17   : > { %s3614_s10 = sshll.u32 (%p89_p5), %s3905_s21, 3  ;;  %s3239_s11 = sshll.u32 (%p89_p5), %s181_s9, 8 }
  0x18   : > { %s4020_s14 = scalar_lea.vmem (%p89_p5), %s5134_s2, %s3614_s10  ;;  %s4025_s24 = scalar_lea.vmem (%p89_p5), [#allocation3], %s3239_s11 }
  0x19   : > { %v277_v0 = vld [vmem:[%s4020_s14] sm:$0xff] (%p89_p5) }
  0x1a   : > { %v279_v1 = vld [vmem:[%s4020_s14 + $0x40] sm:$0xff] (%p89_p5)  ;;  %278 = vst [vmem:[%s4025_s24] sm:$0xff] (%p89_p5), %v277_v0 }
  0x1b   : > { %v281_v2 = vld [vmem:[%s4020_s14 + $0x80] sm:$0xff]  ;;  %280 = vst [vmem:[%s4025_s24 + $0x8] sm:$0xff] %v279_v1 }
  0x1c   : > { %282 = vst [vmem:[%s4025_s24 + $0x10] sm:$0xff] %v281_v2  ;;  %v283_v3 = vld [vmem:[%s4020_s14 + $0xc0] sm:$0xff] }
  0x1d   : > { %v285_v4 = vld [vmem:[%s4020_s14 + $0x100] sm:$0xff]  ;;  %284 = vst [vmem:[%s4025_s24 + $0x18] sm:$0xff] %v283_v3 }
  0x1e   : > { %v287_v5 = vld [vmem:[%s4020_s14 + $0x140] sm:$0xff]  ;;  %286 = vst [vmem:[%s4025_s24 + $0x20] sm:$0xff] %v285_v4 }
  0x1f   : > { %288 = vst [vmem:[%s4025_s24 + $0x28] sm:$0xff] %v287_v5  ;;  %v289_v6 = vld [vmem:[%s4020_s14 + $0x180] sm:$0xff] }
  0x20   : > { %v291_v7 = vld [vmem:[%s4020_s14 + $0x1c0] sm:$0xff]  ;;  %290 = vst [vmem:[%s4025_s24 + $0x30] sm:$0xff] %v289_v6 }
  0x21   : > { %v293_v8 = vld [vmem:[%s4020_s14 + $0x200] sm:$0xff]  ;;  %292 = vst [vmem:[%s4025_s24 + $0x38] sm:$0xff] %v291_v7 }
  0x22   : > { %294 = vst [vmem:[%s4025_s24 + $0x40] sm:$0xff] %v293_v8  ;;  %v295_v9 = vld [vmem:[%s4020_s14 + $0x240] sm:$0xff] }
  0x23   : > { %v297_v10 = vld [vmem:[%s4020_s14 + $0x280] sm:$0xff]  ;;  %296 = vst [vmem:[%s4025_s24 + $0x48] sm:$0xff] %v295_v9 }
  0x24   : > { %v299_v11 = vld [vmem:[%s4020_s14 + $0x2c0] sm:$0xff]  ;;  %298 = vst [vmem:[%s4025_s24 + $0x50] sm:$0xff] %v297_v10 }
  0x25   : > { %300 = vst [vmem:[%s4025_s24 + $0x58] sm:$0xff] %v299_v11  ;;  %v301_v12 = vld [vmem:[%s4020_s14 + $0x300] sm:$0xff] }
  0x26   : > { %v303_v13 = vld [vmem:[%s4020_s14 + $0x340] sm:$0xff]  ;;  %302 = vst [vmem:[%s4025_s24 + $0x60] sm:$0xff] %v301_v12 }
  0x27   : > { %v305_v14 = vld [vmem:[%s4020_s14 + $0x380] sm:$0xff]  ;;  %304 = vst [vmem:[%s4025_s24 + $0x68] sm:$0xff] %v303_v13 }
  0x28   : > { %306 = vst [vmem:[%s4025_s24 + $0x70] sm:$0xff] %v305_v14  ;;  %v307_v15 = vld [vmem:[%s4020_s14 + $0x3c0] sm:$0xff] }
  0x29   : > { %v309_v16 = vld [vmem:[%s4020_s14 + $0x400] sm:$0xff]  ;;  %308 = vst [vmem:[%s4025_s24 + $0x78] sm:$0xff] %v307_v15 }
  0x2a   : > { %v311_v17 = vld [vmem:[%s4020_s14 + $0x440] sm:$0xff]  ;;  %310 = vst [vmem:[%s4025_s24 + $0x80] sm:$0xff] %v309_v16 }
  0x2b   : > { %312 = vst [vmem:[%s4025_s24 + $0x88] sm:$0xff] %v311_v17  ;;  %v313_v18 = vld [vmem:[%s4020_s14 + $0x480] sm:$0xff] }
  0x2c   : > { %v315_v19 = vld [vmem:[%s4020_s14 + $0x4c0] sm:$0xff]  ;;  %314 = vst [vmem:[%s4025_s24 + $0x90] sm:$0xff] %v313_v18 }
  0x2d   : > { %v317_v20 = vld [vmem:[%s4020_s14 + $0x500] sm:$0xff]  ;;  %316 = vst [vmem:[%s4025_s24 + $0x98] sm:$0xff] %v315_v19 }
  0x2e   : > { %318 = vst [vmem:[%s4025_s24 + $0xa0] sm:$0xff] %v317_v20  ;;  %v319_v21 = vld [vmem:[%s4020_s14 + $0x540] sm:$0xff] }
  0x2f   : > { %v321_v22 = vld [vmem:[%s4020_s14 + $0x580] sm:$0xff]  ;;  %320 = vst [vmem:[%s4025_s24 + $0xa8] sm:$0xff] %v319_v21 }
  0x30   : > { %v323_v23 = vld [vmem:[%s4020_s14 + $0x5c0] sm:$0xff]  ;;  %322 = vst [vmem:[%s4025_s24 + $0xb0] sm:$0xff] %v321_v22 }
  0x31   : > { %324 = vst [vmem:[%s4025_s24 + $0xb8] sm:$0xff] %v323_v23  ;;  %v325_v24 = vld [vmem:[%s4020_s14 + $0x600] sm:$0xff] }
  0x32   : > { %v327_v25 = vld [vmem:[%s4020_s14 + $0x640] sm:$0xff]  ;;  %326 = vst [vmem:[%s4025_s24 + $0xc0] sm:$0xff] %v325_v24 }
  0x33   : > { %v329_v26 = vld [vmem:[%s4020_s14 + $0x680] sm:$0xff]  ;;  %328 = vst [vmem:[%s4025_s24 + $0xc8] sm:$0xff] %v327_v25 }
  0x34   : > { %330 = vst [vmem:[%s4025_s24 + $0xd0] sm:$0xff] %v329_v26  ;;  %v331_v27 = vld [vmem:[%s4020_s14 + $0x6c0] sm:$0xff] }
  0x35   : > { %v333_v28 = vld [vmem:[%s4020_s14 + $0x700] sm:$0xff]  ;;  %332 = vst [vmem:[%s4025_s24 + $0xd8] sm:$0xff] %v331_v27 }
  0x36   : > { %v335_v29 = vld [vmem:[%s4020_s14 + $0x740] sm:$0xff]  ;;  %334 = vst [vmem:[%s4025_s24 + $0xe0] sm:$0xff] %v333_v28 }
  0x37   : > { %336 = vst [vmem:[%s4025_s24 + $0xe8] sm:$0xff] %v335_v29  ;;  %v337_v30 = vld [vmem:[%s4020_s14 + $0x780] sm:$0xff] }
  0x38   : > { %v339_v31 = vld [vmem:[%s4020_s14 + $0x7c0] sm:$0xff]  ;;  %338 = vst [vmem:[%s4025_s24 + $0xf0] sm:$0xff] %v337_v30 }
  0x39   : > { %340 = vst [vmem:[%s4025_s24 + $0xf8] sm:$0xff] %v339_v31 }
  0x3a PF: > { %p3242_p11 = scmp.ge.s32.totalorder %s3913_s23, 1  ;;  %p345_p12 = scmp.lt.s32.totalorder %s3913_s23, 17 }
  0x3c   : > { %p346_p13 = pnand %p3242_p11, %p345_p12 }
  0x3d   : > { %s352_s27 = sand.u32 (!%p346_p13), 1, %s3889_s17   ;;  %s378_s28 = sand.u32 (!%p346_p13), 1, %s3881_s15  }
  0x3e   : > { %349 = sbr.rel (%p346_p13) target bundleno = 1011 (0x3f3), region = 70  ;;  %s3243_s29 = sshll.u32 (!%p346_p13), %s352_s27, 8 }
  0x3f   : > { %s3244_s5 = sshll.u32 (!%p346_p13), %s378_s28, 8  ;;  %p381_p0 = scmp.lt.s32.totalorder (!%p346_p13), %s3901_s20, 1 }
  0x40   : > { %s4099_s13 = scalar_lea.vmem (!%p346_p13), [#allocation3], %s3243_s29  ;;  %s4101_s14 = scalar_lea.vmem (!%p346_p13), [#allocation4], %s3244_s5 }
  0x41   : > { %p3247_p1 = scmp.ne.s32.totalorder (!%p346_p13), %s3897_s19, 0 }
  0x43   : > { %s382_s6 = scalar_select %p381_p0, %s3901_s20, 1 }
  0x44   : > { %391 = sbr.rel (%p3247_p1) target bundleno = 343 (0x157), region = 78 }
  0x45   : > { %s3615_s9 = sshll.u32 %s382_s6, 9 }
  0x46   : > { %s4097_s12 = scalar_lea.vmem %s5132_s0, %s3615_s9 }
  0x49   : > { %v3690_v32 = vld [vmem:[%s4097_s12 + $0x74] ss:$8 sps:$4 sm:$0xff]   ;;  %v3694_v34 = vld [vmem:[%s4097_s12 + $0x70] ss:$8 sps:$4 sm:$0xff]   ;;  %v3696_v36 = vld [vmem:[%s4097_s12 + $0x64] ss:$8 sps:$4 sm:$0xff]  }
  0x4a   : > { %v3692_v33 = vld [vmem:[%s4097_s12 + $0x174] ss:$8 sps:$4 sm:$0xff]   ;;  %800 = vmatprep.subr.bf16.mxu0 %v3690_v32  ;;  %v3695_v35 = vld [vmem:[%s4097_s12 + $0x170] ss:$8 sps:$4 sm:$0xff]   ;;  %v3698_v37 = vld [vmem:[%s4097_s12 + $0x164] ss:$8 sps:$4 sm:$0xff]  }
  0x4b   : > { %843 = vmatprep.subr.bf16.mxu1 %v3692_v33  ;;  %801 = vmatpush1.bf16.msra.mxu0 %v3694_v34  ;;  %v3700_v38 = vld [vmem:[%s4097_s12 + $0x60] ss:$8 sps:$4 sm:$0xff]   ;;  %v3702_v40 = vld [vmem:[%s4097_s12 + $0x54] ss:$8 sps:$4 sm:$0xff]   ;;  %v3706_v42 = vld [vmem:[%s4097_s12 + $0x50] ss:$8 sps:$4 sm:$0xff]  }
  0x4c   : > { %844 = vmatpush1.bf16.msra.mxu1 %v3695_v35  ;;  %802 = vmatprep.subr.bf16.mxu0 %v3696_v36  ;;  %v3701_v39 = vld [vmem:[%s4097_s12 + $0x160] ss:$8 sps:$4 sm:$0xff]   ;;  %v3704_v41 = vld [vmem:[%s4097_s12 + $0x154] ss:$8 sps:$4 sm:$0xff]   ;;  %v3707_v43 = vld [vmem:[%s4097_s12 + $0x150] ss:$8 sps:$4 sm:$0xff]  }
  0x4d   : > { %845 = vmatprep.subr.bf16.mxu1 %v3698_v37  ;;  %v3708_v44 = vld [vmem:[%s4097_s12 + $0x44] ss:$8 sps:$4 sm:$0xff]   ;;  %v3712_v46 = vld [vmem:[%s4097_s12 + $0x40] ss:$8 sps:$4 sm:$0xff]   ;;  %v3714_v48 = vld [vmem:[%s4097_s12 + $0x34] ss:$8 sps:$4 sm:$0xff]  }
  0x4e   : > { %v3710_v45 = vld [vmem:[%s4097_s12 + $0x144] ss:$8 sps:$4 sm:$0xff]   ;;  %v3713_v47 = vld [vmem:[%s4097_s12 + $0x140] ss:$8 sps:$4 sm:$0xff]   ;;  %v3716_v49 = vld [vmem:[%s4097_s12 + $0x134] ss:$8 sps:$4 sm:$0xff]  }
  0x4f   : > { %803 = vmatpush1.bf16.msra.mxu0 %v3700_v38  ;;  %v3718_v50 = vld [vmem:[%s4097_s12 + $0x30] ss:$8 sps:$4 sm:$0xff]   ;;  %v3720_v52 = vld [vmem:[%s4097_s12 + $0x24] ss:$8 sps:$4 sm:$0xff]   ;;  %v3724_v54 = vld [vmem:[%s4097_s12 + $0x20] ss:$8 sps:$4 sm:$0xff]  }
  0x50   : > { %846 = vmatpush1.bf16.msra.mxu1 %v3701_v39  ;;  %804 = vmatprep.subr.bf16.mxu0 %v3702_v40  ;;  %v3719_v51 = vld [vmem:[%s4097_s12 + $0x130] ss:$8 sps:$4 sm:$0xff]   ;;  %v3722_v53 = vld [vmem:[%s4097_s12 + $0x124] ss:$8 sps:$4 sm:$0xff]   ;;  %v3725_v55 = vld [vmem:[%s4097_s12 + $0x120] ss:$8 sps:$4 sm:$0xff]  }
  0x51   : > { %847 = vmatprep.subr.bf16.mxu1 %v3704_v41  ;;  %v3726_v56 = vld [vmem:[%s4097_s12 + $0x14] ss:$8 sps:$4 sm:$0xff]   ;;  %v3730_v58 = vld [vmem:[%s4097_s12 + $0x10] ss:$8 sps:$4 sm:$0xff]   ;;  %v3732_v60 = vld [vmem:[%s4097_s12 + $0x4] ss:$8 sps:$4 sm:$0xff]  }
  0x52   : > { %v3728_v57 = vld [vmem:[%s4097_s12 + $0x114] ss:$8 sps:$4 sm:$0xff]   ;;  %v3731_v59 = vld [vmem:[%s4097_s12 + $0x110] ss:$8 sps:$4 sm:$0xff]   ;;  %v3734_v61 = vld [vmem:[%s4097_s12 + $0x104] ss:$8 sps:$4 sm:$0xff]  }
  0x53   : > { %805 = vmatpush1.bf16.msra.mxu0 %v3706_v42  ;;  %v3736_v62 = vld [vmem:[%s4097_s12] ss:$8 sps:$4 sm:$0xff]   ;;  %v3738_v0 = vld [vmem:[%s4097_s12 + $0xf4] ss:$8 sps:$4 sm:$0xff]   ;;  %v3742_v2 = vld [vmem:[%s4097_s12 + $0xf0] ss:$8 sps:$4 sm:$0xff]  }
  0x54   : > { %848 = vmatpush1.bf16.msra.mxu1 %v3707_v43  ;;  %806 = vmatprep.subr.bf16.mxu0 %v3708_v44  ;;  %v3737_v63 = vld [vmem:[%s4097_s12 + $0x100] ss:$8 sps:$4 sm:$0xff]   ;;  %v3740_v1 = vld [vmem:[%s4097_s12 + $0x1f4] ss:$8 sps:$4 sm:$0xff]   ;;  %v3743_v3 = vld [vmem:[%s4097_s12 + $0x1f0] ss:$8 sps:$4 sm:$0xff]  }
  0x55   : > { %849 = vmatprep.subr.bf16.mxu1 %v3710_v45  ;;  %v3744_v4 = vld [vmem:[%s4097_s12 + $0xe4] ss:$8 sps:$4 sm:$0xff]   ;;  %v3748_v6 = vld [vmem:[%s4097_s12 + $0xe0] ss:$8 sps:$4 sm:$0xff]   ;;  %v3750_v8 = vld [vmem:[%s4097_s12 + $0xd4] ss:$8 sps:$4 sm:$0xff]  }
  0x56   : > { %v3746_v5 = vld [vmem:[%s4097_s12 + $0x1e4] ss:$8 sps:$4 sm:$0xff]   ;;  %v3749_v7 = vld [vmem:[%s4097_s12 + $0x1e0] ss:$8 sps:$4 sm:$0xff]   ;;  %v3752_v9 = vld [vmem:[%s4097_s12 + $0x1d4] ss:$8 sps:$4 sm:$0xff]  }
  0x57   : > { %807 = vmatpush1.bf16.msra.mxu0 %v3712_v46  ;;  %v3754_v10 = vld [vmem:[%s4097_s12 + $0xd0] ss:$8 sps:$4 sm:$0xff]   ;;  %v3756_v12 = vld [vmem:[%s4097_s12 + $0xc4] ss:$8 sps:$4 sm:$0xff]   ;;  %v3760_v14 = vld [vmem:[%s4097_s12 + $0xc0] ss:$8 sps:$4 sm:$0xff]  }
  0x58   : > { %850 = vmatpush1.bf16.msra.mxu1 %v3713_v47  ;;  %808 = vmatprep.subr.bf16.mxu0 %v3714_v48  ;;  %v3755_v11 = vld [vmem:[%s4097_s12 + $0x1d0] ss:$8 sps:$4 sm:$0xff]   ;;  %v3758_v13 = vld [vmem:[%s4097_s12 + $0x1c4] ss:$8 sps:$4 sm:$0xff]   ;;  %v3761_v16 = vld [vmem:[%s4097_s12 + $0x1c0] ss:$8 sps:$4 sm:$0xff]  }
  0x59   : > { %851 = vmatprep.subr.bf16.mxu1 %v3716_v49  ;;  %v3788_v15 = vld [vmem:[%s5133_s1 + $0x4] ss:$16 sps:$4 sm:$0xff]   ;;  %v3791_v19 = vld [vmem:[%s5133_s1 + $0xc] ss:$16 sps:$4 sm:$0xff]   ;;  %v3766_v20 = vld [vmem:[%s4097_s12 + $0xb0] ss:$8 sps:$4 sm:$0xff]  }
  0x5a   : > { %v3762_v17 = vld [vmem:[%s4097_s12 + $0xb4] ss:$8 sps:$4 sm:$0xff]   ;;  %832 = vmatprep.mubr.bf16.mxu0 %v3788_v15  ;;  %875 = vmatprep.mubr.bf16.mxu1 %v3791_v19  ;;  %v3767_v21 = vld [vmem:[%s4097_s12 + $0x1b0] ss:$8 sps:$4 sm:$0xff]   ;;  %v3768_v22 = vld [vmem:[%s4097_s12 + $0xa4] ss:$8 sps:$4 sm:$0xff]  }
  0x5b   : > { %809 = vmatpush1.bf16.msra.mxu0 %v3718_v50  ;;  %v3764_v18 = vld [vmem:[%s4097_s12 + $0x1b4] ss:$8 sps:$4 sm:$0xff]   ;;  %v3770_v23 = vld [vmem:[%s4097_s12 + $0x1a4] ss:$8 sps:$4 sm:$0xff]   ;;  %v3772_v24 = vld [vmem:[%s4097_s12 + $0xa0] ss:$8 sps:$4 sm:$0xff]  }
  0x5c   : > { %852 = vmatpush1.bf16.msra.mxu1 %v3719_v51  ;;  %810 = vmatprep.subr.bf16.mxu0 %v3720_v52  ;;  %v3773_v25 = vld [vmem:[%s4097_s12 + $0x1a0] ss:$8 sps:$4 sm:$0xff]   ;;  %v3774_v26 = vld [vmem:[%s4097_s12 + $0x94] ss:$8 sps:$4 sm:$0xff]   ;;  %v3778_v28 = vld [vmem:[%s4097_s12 + $0x90] ss:$8 sps:$4 sm:$0xff]  }
  0x5d   : > { %853 = vmatprep.subr.bf16.mxu1 %v3722_v53  ;;  %v3776_v27 = vld [vmem:[%s4097_s12 + $0x194] ss:$8 sps:$4 sm:$0xff]   ;;  %v3779_v29 = vld [vmem:[%s4097_s12 + $0x190] ss:$8 sps:$4 sm:$0xff]   ;;  %v3780_v30 = vld [vmem:[%s4097_s12 + $0x84] ss:$8 sps:$4 sm:$0xff]  }
  0x5e   : > { %v3782_v31 = vld [vmem:[%s4097_s12 + $0x184] ss:$8 sps:$4 sm:$0xff]   ;;  %v3784_v32 = vld [vmem:[%s4097_s12 + $0x80] ss:$8 sps:$4 sm:$0xff]  }
  0x5f   : > { %811 = vmatpush1.bf16.msra.mxu0 %v3724_v54  ;;  %v3785_v33 = vld [vmem:[%s4097_s12 + $0x180] ss:$8 sps:$4 sm:$0xff]  }
  0x60   : > { %854 = vmatpush1.bf16.msra.mxu1 %v3725_v55  ;;  %812 = vmatprep.subr.bf16.mxu0 %v3726_v56  ;;  %v3786_v34 = vld [vmem:[%s5133_s1] ss:$16 sps:$4 sm:$0xff]   ;;  %v3789_v35 = vld [vmem:[%s5133_s1 + $0x8] ss:$16 sps:$4 sm:$0xff]  }
  0x61   : > { %855 = vmatprep.subr.bf16.mxu1 %v3728_v57 }
  0x63   : > { %813 = vmatpush1.bf16.msra.mxu0 %v3730_v58 }
  0x64   : > { %856 = vmatpush1.bf16.msra.mxu1 %v3731_v59  ;;  %814 = vmatprep.subr.bf16.mxu0 %v3732_v60 }
  0x65   : > { %857 = vmatprep.subr.bf16.mxu1 %v3734_v61 }
  0x67   : > { %815 = vmatpush1.bf16.msra.mxu0 %v3736_v62 }
  0x68   : > { %858 = vmatpush1.bf16.msra.mxu1 %v3737_v63  ;;  %816 = vmatprep.subr.bf16.mxu0 %v3738_v0 }
  0x69   : > { %859 = vmatprep.subr.bf16.mxu1 %v3740_v1 }
  0x6b   : > { %817 = vmatpush2.bf16.msra.mxu0 %v3742_v2 }
  0x6c   : > { %860 = vmatpush2.bf16.msra.mxu1 %v3743_v3  ;;  %818 = vmatprep.subr.bf16.mxu0 %v3744_v4 }
  0x6d   : > { %861 = vmatprep.subr.bf16.mxu1 %v3746_v5 }
  0x6f   : > { %819 = vmatpush2.bf16.msra.mxu0 %v3748_v6 }
  0x70   : > { %862 = vmatpush2.bf16.msra.mxu1 %v3749_v7  ;;  %820 = vmatprep.subr.bf16.mxu0 %v3750_v8 }
  0x71   : > { %863 = vmatprep.subr.bf16.mxu1 %v3752_v9 }
  0x73   : > { %821 = vmatpush2.bf16.msra.mxu0 %v3754_v10 }
  0x74   : > { %864 = vmatpush2.bf16.msra.mxu1 %v3755_v11  ;;  %822 = vmatprep.subr.bf16.mxu0 %v3756_v12 }
  0x75   : > { %865 = vmatprep.subr.bf16.mxu1 %v3758_v13 }
  0x77   : > { %823 = vmatpush2.bf16.msra.mxu0 %v3760_v14 }
  0x78   : > { %866 = vmatpush2.bf16.msra.mxu1 %v3761_v16  ;;  %824 = vmatprep.subr.bf16.mxu0 %v3762_v17 }
  0x79   : > { %867 = vmatprep.subr.bf16.mxu1 %v3764_v18 }
  0x7b   : > { %825 = vmatpush2.bf16.msra.mxu0 %v3766_v20 }
  0x7c   : > { %868 = vmatpush2.bf16.msra.mxu1 %v3767_v21  ;;  %826 = vmatprep.subr.bf16.mxu0 %v3768_v22 }
  0x7d   : > { %869 = vmatprep.subr.bf16.mxu1 %v3770_v23 }
  0x7f   : > { %827 = vmatpush2.bf16.msra.mxu0 %v3772_v24 }
  0x80   : > { %870 = vmatpush2.bf16.msra.mxu1 %v3773_v25  ;;  %828 = vmatprep.subr.bf16.mxu0 %v3774_v26 }
  0x81   : > { %871 = vmatprep.subr.bf16.mxu1 %v3776_v27 }
  0x83   : > { %829 = vmatpush2.bf16.msra.mxu0 %v3778_v28 }
  0x84   : > { %872 = vmatpush2.bf16.msra.mxu1 %v3779_v29  ;;  %830 = vmatprep.subr.bf16.mxu0 %v3780_v30 }
  0x85   : > { %873 = vmatprep.subr.bf16.mxu1 %v3782_v31 }
  0x87   : > { %831 = vmatpush2.bf16.msra.mxu0 %v3784_v32 }
  0x88   : > { %874 = vmatpush2.bf16.msra.mxu1 %v3785_v33 }
  0x8a   : > { %833 = vmatmul.mubr.bf16.vlgmr.msra.gmra.mxu0 %v3786_v34 }
  0x8b   : > { %876 = vmatmul.mubr.bf16.vlgmr.msra.gmra.mxu1 %v3789_v35 }
 0x14a   : > { %v834_v36 = vpop.f32.mrf.mxu0 }
 0x14b   : > { %v877_v37 = vpop.f32.mrf.mxu1 }
 0x14c   : > { %v836_v38 = vpop.f32.mrf.mxu0  ;;  %v878_v40 = vadd.f32 %v877_v37, %v834_v36 }
 0x14d   : > { %v879_v39 = vpop.f32.mrf.mxu1 }
 0x14e   : > { %v880_v41 = vadd.f32 %v879_v39, %v836_v38  ;;  %v838_v42 = vpop.f32.mrf.mxu0 }
 0x14f   : > { %v881_v43 = vpop.f32.mrf.mxu1 }
 0x150   : > { %v3616_v44 = vpack.c.bf16 %v880_v41, %v878_v40  ;;  %v840_v45 = vpop.f32.mrf.mxu0  ;;  %v882_v47 = vadd.f32 %v881_v43, %v838_v42 }
 0x151   : > { %v883_v46 = vpop.f32.mrf.mxu1 }
 0x152   : > { %898 = vst [vmem:[#allocation2] sm:$0xff] %v3616_v44  ;;  %v884_v48 = vadd.f32 %v883_v46, %v840_v45 }
 0x154   : > { %v3617_v49 = vpack.c.bf16 %v884_v48, %v882_v47 }
 0x156   : > { %899 = vst [vmem:[#allocation2 + $0x8] sm:$0xff] %v3617_v49 }
 0x157 PF: > { %v3792_v50 = vld [vmem:[%s4099_s13 + $0x74] ss:$8 sps:$4 sm:$0xff]   ;;  %v3794_v51 = vld [vmem:[%s4099_s13 + $0x70] ss:$8 sps:$4 sm:$0xff]   ;;  %v3795_v52 = vld [vmem:[%s4099_s13 + $0x64] ss:$8 sps:$4 sm:$0xff]  }
 0x158   : > { %1104 = vmatprep.subr.bf16.mxu0 %v3792_v50  ;;  %v3797_v53 = vld [vmem:[%s4099_s13 + $0x60] ss:$8 sps:$4 sm:$0xff]   ;;  %v3798_v54 = vld [vmem:[%s4099_s13 + $0x54] ss:$8 sps:$4 sm:$0xff]   ;;  %v3800_v55 = vld [vmem:[%s4099_s13 + $0x50] ss:$8 sps:$4 sm:$0xff]  }
 0x159   : > { %1105 = vmatpush1.bf16.msra.mxu0 %v3794_v51  ;;  %v3801_v56 = vld [vmem:[%s4099_s13 + $0x44] ss:$8 sps:$4 sm:$0xff]   ;;  %v3803_v57 = vld [vmem:[%s4099_s13 + $0x40] ss:$8 sps:$4 sm:$0xff]   ;;  %v3804_v58 = vld [vmem:[%s4099_s13 + $0x34] ss:$8 sps:$4 sm:$0xff]  }
 0x15a   : > { %1106 = vmatprep.subr.bf16.mxu0 %v3795_v52  ;;  %v3806_v59 = vld [vmem:[%s4099_s13 + $0x30] ss:$8 sps:$4 sm:$0xff]   ;;  %v3807_v60 = vld [vmem:[%s4099_s13 + $0x24] ss:$8 sps:$4 sm:$0xff]   ;;  %v3809_v61 = vld [vmem:[%s4099_s13 + $0x20] ss:$8 sps:$4 sm:$0xff]  }
 0x15b   : > { %v3810_v62 = vld [vmem:[%s4099_s13 + $0x14] ss:$8 sps:$4 sm:$0xff]   ;;  %v3812_v1 = vld [vmem:[%s4099_s13 + $0x10] ss:$8 sps:$4 sm:$0xff]   ;;  %v3813_v3 = vld [vmem:[%s4099_s13 + $0x4] ss:$8 sps:$4 sm:$0xff]  }
 0x15c   : > { %v1261_v0 = vld [vmem:[%s5135_s3 + $0x380] sm:$0xff]  ;;  %v3815_v11 = vld [vmem:[%s4099_s13] ss:$8 sps:$4 sm:$0xff]   ;;  %v3819_v19 = vld [vmem:[%s4099_s13 + $0xe4] ss:$8 sps:$4 sm:$0xff]   ;;  %s3609_s28 = sshll.u32 (%p4007_p9), %s3897_s19, 4 }
 0x15d   : > { %1107 = vmatpush1.bf16.msra.mxu0 %v3797_v53  ;;  %v3842_v63 = vld [vmem:[#allocation2 + $0x4] ss:$8 sps:$4 sm:$0xff]   ;;  %v3818_v17 = vld [vmem:[%s4099_s13 + $0xf0] ss:$8 sps:$4 sm:$0xff]   ;;  %v3821_v23 = vld [vmem:[%s4099_s13 + $0xe0] ss:$8 sps:$4 sm:$0xff]  }
 0x15e   : > { %1108 = vmatprep.subr.bf16.mxu0 %v3798_v54  ;;  %v1269_v2 = vld [vmem:[%s5135_s3 + $0x3c0] sm:$0xff]  ;;  %1136 = vmatprep.mubr.bf16.mxu0 %v3842_v63  ;;  %v3825_v31 = vld [vmem:[%s4099_s13 + $0xc4] ss:$8 sps:$4 sm:$0xff]   ;;  %v3827_v35 = vld [vmem:[%s4099_s13 + $0xc0] ss:$8 sps:$4 sm:$0xff]   ;;  %s3610_s29 = sshll.u32 (%p4007_p9), %s3901_s20, 8 }
 0x15f   : > { %v3465_v4 = vcombine.high %v1261_v0, %v1269_v2  ;;  %v1245_v5 = vld [vmem:[%s5135_s3 + $0x300] sm:$0xff]  ;;  %v3464_v7 = vcombine.low %v1261_v0, %v1269_v2  ;;  %v3831_v43 = vld [vmem:[%s4099_s13 + $0xa4] ss:$8 sps:$4 sm:$0xff]   ;;  %v3833_v47 = vld [vmem:[%s4099_s13 + $0xa0] ss:$8 sps:$4 sm:$0xff]   ;;  %s3070_s7 = sadd.s32 (%p4007_p9), %s3610_s29, %s3609_s28 }
 0x160   : > { %v1253_v6 = vld [vmem:[%s5135_s3 + $0x340] sm:$0xff]  ;;  %v1246_v0 = vld [vmem:[%s5135_s3 + $0x308] sm:$0xff]  ;;  %s3611_s5 = sshll.u32 (%p4007_p9), %s3070_s7, 3 }
 0x161   : > { %1109 = vmatpush1.bf16.msra.mxu0 %v3800_v55  ;;  %v3449_v8 = vcombine.high %v1245_v5, %v1253_v6  ;;  %v1229_v9 = vld [vmem:[%s5135_s3 + $0x280] sm:$0xff]  ;;  %2685 = vmatprep.subr.bf16.mxu1 %v3465_v4  ;;  %v3448_v12 = vcombine.low %v1245_v5, %v1253_v6  ;;  %v3837_v55 = vld [vmem:[%s4099_s13 + $0x84] ss:$8 sps:$4 sm:$0xff]   ;;  %v1254_v2 = vld [vmem:[%s5135_s3 + $0x348] sm:$0xff]  ;;  %s5048_s10 = scalar_lea.vmem (%p4007_p9), %s5136_s4, %s3611_s5 }
 0x162   : > { %1110 = vmatprep.subr.bf16.mxu0 %v3801_v56  ;;  %v1237_v10 = vld [vmem:[%s5135_s3 + $0x2c0] sm:$0xff]  ;;  %2686 = vmatpush1.bf16.msra.mxu1 %v3464_v7  ;;  %v1262_v56 = vld [vmem:[%s5135_s3 + $0x388] sm:$0xff] }
 0x163   : > { %v3816_v13 = vld [vmem:[%s4099_s13 + $0xf4] ss:$8 sps:$4 sm:$0xff]   ;;  %2687 = vmatprep.subr.bf16.mxu1 %v3449_v8  ;;  %v3433_v14 = vcombine.high %v1229_v9, %v1237_v10  ;;  %v3432_v18 = vcombine.low %v1229_v9, %v1237_v10  ;;  %v3824_v29 = vld [vmem:[%s4099_s13 + $0xd0] ss:$8 sps:$4 sm:$0xff]   ;;  %v3451_v8 = vcombine.high %v1246_v0, %v1254_v2 }
 0x164   : > { %v1213_v15 = vld [vmem:[%s5135_s3 + $0x200] sm:$0xff]  ;;  %v1230_v9 = vld [vmem:[%s5135_s3 + $0x288] sm:$0xff] }
 0x165   : > { %1111 = vmatpush1.bf16.msra.mxu0 %v3803_v57  ;;  %v1221_v16 = vld [vmem:[%s5135_s3 + $0x240] sm:$0xff] }
 0x166   : > { %1112 = vmatprep.subr.bf16.mxu0 %v3804_v58  ;;  %2688 = vmatpush1.bf16.msra.mxu1 %v3448_v12  ;;  %v3417_v20 = vcombine.high %v1213_v15, %v1221_v16  ;;  %v1197_v21 = vld [vmem:[%s5135_s3 + $0x180] sm:$0xff]  ;;  %v3416_v24 = vcombine.low %v1213_v15, %v1221_v16  ;;  %v1270_v58 = vld [vmem:[%s5135_s3 + $0x3c8] sm:$0xff] }
 0x167   : > { %2689 = vmatprep.subr.bf16.mxu1 %v3433_v14  ;;  %v1205_v22 = vld [vmem:[%s5135_s3 + $0x1c0] sm:$0xff]  ;;  %v3467_v63 = vcombine.high %v1262_v56, %v1270_v58  ;;  %v3466_v6 = vcombine.low %v1262_v56, %v1270_v58  ;;  %v3450_v14 = vcombine.low %v1246_v0, %v1254_v2  ;;  %v1350_v56 = vld [vmem:[%s5135_s3 + $0x648] sm:$0xff] }
 0x168   : > { %v3822_v25 = vld [vmem:[%s4099_s13 + $0xd4] ss:$8 sps:$4 sm:$0xff]   ;;  %v3401_v26 = vcombine.high %v1197_v21, %v1205_v22  ;;  %v3400_v30 = vcombine.low %v1197_v21, %v1205_v22  ;;  %v3830_v41 = vld [vmem:[%s4099_s13 + $0xb0] ss:$8 sps:$4 sm:$0xff]  }
 0x169   : > { %1113 = vmatpush1.bf16.msra.mxu0 %v3806_v59  ;;  %v1181_v27 = vld [vmem:[%s5135_s3 + $0x100] sm:$0xff]  ;;  %v1318_v0 = vld [vmem:[%s5135_s3 + $0x548] sm:$0xff] }
 0x16a   : > { %1114 = vmatprep.subr.bf16.mxu0 %v3807_v60  ;;  %2690 = vmatpush1.bf16.msra.mxu1 %v3432_v18  ;;  %v1189_v28 = vld [vmem:[%s5135_s3 + $0x140] sm:$0xff] }
 0x16b   : > { %2691 = vmatprep.subr.bf16.mxu1 %v3417_v20  ;;  %v3385_v32 = vcombine.high %v1181_v27, %v1189_v28  ;;  %v1165_v33 = vld [vmem:[%s5135_s3 + $0x80] sm:$0xff]  ;;  %v3384_v36 = vcombine.low %v1181_v27, %v1189_v28  ;;  %v1206_v27 = vld [vmem:[%s5135_s3 + $0x1c8] sm:$0xff] }
 0x16c   : > { %v1173_v34 = vld [vmem:[%s5135_s3 + $0xc0] sm:$0xff] }
 0x16d   : > { %1115 = vmatpush1.bf16.msra.mxu0 %v3809_v61  ;;  %v3828_v37 = vld [vmem:[%s4099_s13 + $0xb4] ss:$8 sps:$4 sm:$0xff]   ;;  %v3369_v38 = vcombine.high %v1165_v33, %v1173_v34  ;;  %v3368_v42 = vcombine.low %v1165_v33, %v1173_v34  ;;  %v3836_v53 = vld [vmem:[%s4099_s13 + $0x90] ss:$8 sps:$4 sm:$0xff]   ;;  %v3839_v61 = vld [vmem:[%s4099_s13 + $0x80] ss:$8 sps:$4 sm:$0xff]  }
 0x16e   : > { %1116 = vmatprep.subr.bf16.mxu0 %v3810_v62  ;;  %2692 = vmatpush1.bf16.msra.mxu1 %v3416_v24  ;;  %v1149_v39 = vld [vmem:[%s5135_s3] sm:$0xff] }
 0x16f   : > { %2693 = vmatprep.subr.bf16.mxu1 %v3401_v26  ;;  %v1157_v40 = vld [vmem:[%s5135_s3 + $0x40] sm:$0xff]  ;;  %v1198_v26 = vld [vmem:[%s5135_s3 + $0x188] sm:$0xff] }
 0x170   : > { %v3353_v44 = vcombine.high %v1149_v39, %v1157_v40  ;;  %v1389_v45 = vld [vmem:[%s5135_s3 + $0x780] sm:$0xff]  ;;  %v3352_v48 = vcombine.low %v1149_v39, %v1157_v40  ;;  %v3402_v33 = vcombine.low %v1198_v26, %v1206_v27  ;;  %v1150_v39 = vld [vmem:[%s5135_s3 + $0x8] sm:$0xff] }
 0x171   : > { %1117 = vmatpush1.bf16.msra.mxu0 %v3812_v1  ;;  %v1397_v46 = vld [vmem:[%s5135_s3 + $0x7c0] sm:$0xff]  ;;  %v1158_v40 = vld [vmem:[%s5135_s3 + $0x48] sm:$0xff] }
 0x172   : > { %1118 = vmatprep.subr.bf16.mxu0 %v3813_v3  ;;  %2694 = vmatpush1.bf16.msra.mxu1 %v3400_v30  ;;  %v3834_v49 = vld [vmem:[%s4099_s13 + $0x94] ss:$8 sps:$4 sm:$0xff]   ;;  %v3593_v50 = vcombine.high %v1389_v45, %v1397_v46  ;;  %v3592_v54 = vcombine.low %v1389_v45, %v1397_v46  ;;  %v3840_v5 = vld [vmem:[#allocation2] ss:$8 sps:$4 sm:$0xff]   ;;  %v3403_v30 = vcombine.high %v1198_v26, %v1206_v27 }
 0x173   : > { %2695 = vmatprep.subr.bf16.mxu1 %v3385_v32  ;;  %v1373_v51 = vld [vmem:[%s5135_s3 + $0x700] sm:$0xff]  ;;  %v1190_v32 = vld [vmem:[%s5135_s3 + $0x148] sm:$0xff]  ;;  %v3354_v45 = vcombine.low %v1150_v39, %v1158_v40 }
 0x174   : > { %v1381_v52 = vld [vmem:[%s5135_s3 + $0x740] sm:$0xff] }
 0x175   : > { %1119 = vmatpush1.bf16.msra.mxu0 %v3815_v11  ;;  %v3577_v57 = vcombine.high %v1373_v51, %v1381_v52  ;;  %v1357_v59 = vld [vmem:[%s5135_s3 + $0x680] sm:$0xff]  ;;  %v3576_v62 = vcombine.low %v1373_v51, %v1381_v52  ;;  %v1238_v11 = vld [vmem:[%s5135_s3 + $0x2c8] sm:$0xff] }
 0x176   : > { %1120 = vmatprep.subr.bf16.mxu0 %v3816_v13  ;;  %2696 = vmatpush1.bf16.msra.mxu1 %v3384_v36  ;;  %v1365_v60 = vld [vmem:[%s5135_s3 + $0x6c0] sm:$0xff]  ;;  %v3435_v16 = vcombine.high %v1230_v9, %v1238_v11  ;;  %v3434_v22 = vcombine.low %v1230_v9, %v1238_v11  ;;  %v1174_v36 = vld [vmem:[%s5135_s3 + $0xc8] sm:$0xff] }
 0x177   : > { %2697 = vmatprep.subr.bf16.mxu1 %v3369_v38  ;;  %v3561_v1 = vcombine.high %v1357_v59, %v1365_v60  ;;  %v1341_v3 = vld [vmem:[%s5135_s3 + $0x600] sm:$0xff]  ;;  %v3560_v7 = vcombine.low %v1357_v59, %v1365_v60  ;;  %v1358_v51 = vld [vmem:[%s5135_s3 + $0x688] sm:$0xff] }
 0x178   : > { %v1349_v4 = vld [vmem:[%s5135_s3 + $0x640] sm:$0xff]  ;;  %v1366_v52 = vld [vmem:[%s5135_s3 + $0x6c8] sm:$0xff] }
 0x179   : > { %1121 = vmatpush2.bf16.msra.mxu0 %v3818_v17  ;;  %v3545_v10 = vcombine.high %v1341_v3, %v1349_v4  ;;  %v1325_v12 = vld [vmem:[%s5135_s3 + $0x580] sm:$0xff]  ;;  %v3544_v15 = vcombine.low %v1341_v3, %v1349_v4  ;;  %v1214_v17 = vld [vmem:[%s5135_s3 + $0x208] sm:$0xff] }
 0x17a   : > { %1122 = vmatprep.subr.bf16.mxu0 %v3819_v19  ;;  %2698 = vmatpush1.bf16.msra.mxu1 %v3368_v42  ;;  %v1333_v13 = vld [vmem:[%s5135_s3 + $0x5c0] sm:$0xff]  ;;  %v1222_v19 = vld [vmem:[%s5135_s3 + $0x248] sm:$0xff]  ;;  %v3355_v42 = vcombine.high %v1150_v39, %v1158_v40 }
 0x17b   : > { %2699 = vmatprep.subr.bf16.mxu1 %v3353_v44  ;;  %v3529_v18 = vcombine.high %v1325_v12, %v1333_v13  ;;  %v1309_v20 = vld [vmem:[%s5135_s3 + $0x500] sm:$0xff]  ;;  %v3419_v24 = vcombine.high %v1214_v17, %v1222_v19  ;;  %v3418_v28 = vcombine.low %v1214_v17, %v1222_v19  ;;  %v1398_v44 = vld [vmem:[%s5135_s3 + $0x7c8] sm:$0xff] }
 0x17c   : > { %v1317_v21 = vld [vmem:[%s5135_s3 + $0x540] sm:$0xff]  ;;  %v1326_v59 = vld [vmem:[%s5135_s3 + $0x588] sm:$0xff] }
 0x17d   : > { %1123 = vmatpush2.bf16.msra.mxu0 %v3821_v23  ;;  %v3528_v23 = vcombine.low %v1325_v12, %v1333_v13  ;;  %v1334_v60 = vld [vmem:[%s5135_s3 + $0x5c8] sm:$0xff]  ;;  %v1293_v4 = vld [vmem:[%s5135_s3 + $0x480] sm:$0xff] }
 0x17e   : > { %1124 = vmatprep.subr.bf16.mxu0 %v3822_v25  ;;  %2700 = vmatpush1.bf16.msra.mxu1 %v3352_v48  ;;  %v3513_v25 = vcombine.high %v1309_v20, %v1317_v21  ;;  %v1382_v48 = vld [vmem:[%s5135_s3 + $0x748] sm:$0xff]  ;;  %v1277_v12 = vld [vmem:[%s5135_s3 + $0x400] sm:$0xff] }
 0x17f   : > { %2701 = vmatprep.subr.bf16.mxu1 %v3593_v50  ;;  %v1285_v13 = vld [vmem:[%s5135_s3 + $0x440] sm:$0xff] }
 0x180   : > { %v3480_v19 = vcombine.low %v1277_v12, %v1285_v13 }
 0x181   : > { %1125 = vmatpush2.bf16.msra.mxu0 %v3824_v29  ;;  %v3512_v29 = vcombine.low %v1309_v20, %v1317_v21  ;;  %v1263_v20 = vld [vmem:[%s5135_s3 + $0x390] sm:$0xff] }
 0x182   : > { %1126 = vmatprep.subr.bf16.mxu0 %v3825_v31  ;;  %2702 = vmatpush2.bf16.msra.mxu1 %v3592_v54  ;;  %v1182_v31 = vld [vmem:[%s5135_s3 + $0x108] sm:$0xff]  ;;  %v3563_v54 = vcombine.high %v1358_v51, %v1366_v52  ;;  %v1271_v21 = vld [vmem:[%s5135_s3 + $0x3d0] sm:$0xff] }
 0x183   : > { %2703 = vmatprep.subr.bf16.mxu1 %v3577_v57  ;;  %v3387_v34 = vcombine.high %v1182_v31, %v1190_v32  ;;  %v3562_v57 = vcombine.low %v1358_v51, %v1366_v52  ;;  %v1224_v51 = vld [vmem:[%s5135_s3 + $0x258] sm:$0xff] }
 0x185   : > { %1127 = vmatpush2.bf16.msra.mxu0 %v3827_v35  ;;  %v1166_v35 = vld [vmem:[%s5135_s3 + $0x88] sm:$0xff] }
 0x186   : > { %1128 = vmatprep.subr.bf16.mxu0 %v3828_v37  ;;  %2704 = vmatpush2.bf16.msra.mxu1 %v3576_v62  ;;  %v3386_v37 = vcombine.low %v1182_v31, %v1190_v32  ;;  %v3371_v38 = vcombine.high %v1166_v35, %v1174_v36  ;;  %v3531_v62 = vcombine.high %v1326_v59, %v1334_v60  ;;  %v1247_v31 = vld [vmem:[%s5135_s3 + $0x310] sm:$0xff] }
 0x187   : > { %2705 = vmatprep.subr.bf16.mxu1 %v3561_v1  ;;  %v3530_v1 = vcombine.low %v1326_v59, %v1334_v60  ;;  %v1208_v59 = vld [vmem:[%s5135_s3 + $0x1d8] sm:$0xff] }
 0x189   : > { %1129 = vmatpush2.bf16.msra.mxu0 %v3830_v41  ;;  %v3370_v41 = vcombine.low %v1166_v35, %v1174_v36  ;;  %v1256_v35 = vld [vmem:[%s5135_s3 + $0x358] sm:$0xff] }
 0x18a   : > { %1130 = vmatprep.subr.bf16.mxu0 %v3831_v43  ;;  %2706 = vmatpush2.bf16.msra.mxu1 %v3560_v7  ;;  %v1390_v43 = vld [vmem:[%s5135_s3 + $0x788] sm:$0xff] }
 0x18b   : > { %2707 = vmatprep.subr.bf16.mxu1 %v3545_v10  ;;  %v3595_v46 = vcombine.high %v1390_v43, %v1398_v44 }
 0x18d   : > { %1131 = vmatpush2.bf16.msra.mxu0 %v3833_v47  ;;  %v1374_v47 = vld [vmem:[%s5135_s3 + $0x708] sm:$0xff] }
 0x18e   : > { %1132 = vmatprep.subr.bf16.mxu0 %v3834_v49  ;;  %2708 = vmatpush2.bf16.msra.mxu1 %v3544_v15  ;;  %v3594_v49 = vcombine.low %v1390_v43, %v1398_v44  ;;  %v3579_v50 = vcombine.high %v1374_v47, %v1382_v48  ;;  %v3481_v15 = vcombine.high %v1277_v12, %v1285_v13  ;;  %v1240_v43 = vld [vmem:[%s5135_s3 + $0x2d8] sm:$0xff] }
 0x18f   : > { %2709 = vmatprep.subr.bf16.mxu1 %v3529_v18 }
 0x191   : > { %1133 = vmatpush2.bf16.msra.mxu0 %v3836_v53  ;;  %v3578_v53 = vcombine.low %v1374_v47, %v1382_v48  ;;  %v1215_v48 = vld [vmem:[%s5135_s3 + $0x210] sm:$0xff] }
 0x192   : > { %1134 = vmatprep.subr.bf16.mxu0 %v3837_v55  ;;  %2710 = vmatpush2.bf16.msra.mxu1 %v3528_v23  ;;  %v1342_v55 = vld [vmem:[%s5135_s3 + $0x608] sm:$0xff]  ;;  %v3469_v23 = vcombine.high %v1263_v20, %v1271_v21 }
 0x193   : > { %2711 = vmatprep.subr.bf16.mxu1 %v3513_v25  ;;  %v3547_v58 = vcombine.high %v1342_v55, %v1350_v56  ;;  %v3468_v25 = vcombine.low %v1263_v20, %v1271_v21 }
 0x195   : > { %1135 = vmatpush2.bf16.msra.mxu0 %v3839_v61  ;;  %v3546_v61 = vcombine.low %v1342_v55, %v1350_v56  ;;  %v1199_v56 = vld [vmem:[%s5135_s3 + $0x190] sm:$0xff] }
 0x196   : > { %2728 = vmatprep.subr.bf16.mxu0 %v3467_v63  ;;  %2712 = vmatpush2.bf16.msra.mxu1 %v3512_v29  ;;  %v1310_v63 = vld [vmem:[%s5135_s3 + $0x508] sm:$0xff] }
 0x197   : > { %v3515_v2 = vcombine.high %v1310_v63, %v1318_v0  ;;  %v3514_v3 = vcombine.low %v1310_v63, %v1318_v0  ;;  %v1183_v0 = vld [vmem:[%s5135_s3 + $0x110] sm:$0xff] }
 0x198   : > { %1137 = vmatmul.mubr.bf16.vlgmr.msra.gmra.mxu0 %v3840_v5  ;;  %v1301_v5 = vld [vmem:[%s5135_s3 + $0x4c0] sm:$0xff] }
 0x199   : > { %2729 = vmatpush1.bf16.msra.mxu0 %v3466_v6  ;;  %v1294_v6 = vld [vmem:[%s5135_s3 + $0x488] sm:$0xff]  ;;  %v3497_v7 = vcombine.high %v1293_v4, %v1301_v5  ;;  %v3496_v11 = vcombine.low %v1293_v4, %v1301_v5 }
 0x19a   : > { %2730 = vmatprep.subr.bf16.mxu0 %v3451_v8  ;;  %v1302_v8 = vld [vmem:[%s5135_s3 + $0x4c8] sm:$0xff] }
 0x19b   : > { %v3498_v9 = vcombine.low %v1294_v6, %v1302_v8  ;;  %v3499_v10 = vcombine.high %v1294_v6, %v1302_v8  ;;  %2713 = vmatprep.subr.bf16.mxu1 %v3497_v7  ;;  %v1167_v8 = vld [vmem:[%s5135_s3 + $0x90] sm:$0xff] }
 0x19c   : > { %2714 = vmatpush2.bf16.msra.mxu1 %v3496_v11  ;;  %v1176_v11 = vld [vmem:[%s5135_s3 + $0xd8] sm:$0xff] }
 0x19d   : > { %2731 = vmatpush1.bf16.msra.mxu0 %v3450_v14  ;;  %v1278_v14 = vld [vmem:[%s5135_s3 + $0x408] sm:$0xff]  ;;  %2715 = vmatprep.subr.bf16.mxu1 %v3481_v15 }
 0x19e   : > { %2732 = vmatprep.subr.bf16.mxu0 %v3435_v16  ;;  %v1286_v16 = vld [vmem:[%s5135_s3 + $0x448] sm:$0xff] }
 0x19f   : > { %v3482_v17 = vcombine.low %v1278_v14, %v1286_v16  ;;  %v3483_v18 = vcombine.high %v1278_v14, %v1286_v16  ;;  %v1151_v16 = vld [vmem:[%s5135_s3 + $0x10] sm:$0xff] }
 0x1a0   : > { %2716 = vmatpush2.bf16.msra.mxu1 %v3480_v19  ;;  %v1160_v19 = vld [vmem:[%s5135_s3 + $0x58] sm:$0xff] }
 0x1a1   : > { %2733 = vmatpush1.bf16.msra.mxu0 %v3434_v22  ;;  %v1264_v22 = vld [vmem:[%s5135_s3 + $0x398] sm:$0xff]  ;;  %2771 = vmatprep.subr.bf16.mxu1 %v3469_v23 }
 0x1a2   : > { %2734 = vmatprep.subr.bf16.mxu0 %v3419_v24  ;;  %v1272_v24 = vld [vmem:[%s5135_s3 + $0x3d8] sm:$0xff] }
 0x1a3   : > { %v3470_v26 = vcombine.low %v1264_v22, %v1272_v24  ;;  %v3471_v27 = vcombine.high %v1264_v22, %v1272_v24  ;;  %v1391_v24 = vld [vmem:[%s5135_s3 + $0x790] sm:$0xff] }
 0x1a5   : > { %2735 = vmatpush1.bf16.msra.mxu0 %v3418_v28 }
 0x1a6   : > { %2736 = vmatprep.subr.bf16.mxu0 %v3403_v30 }
 0x1a9   : > { %2737 = vmatpush1.bf16.msra.mxu0 %v3402_v33  ;;  %v1255_v33 = vld [vmem:[%s5135_s3 + $0x350] sm:$0xff] }
 0x1aa   : > { %2738 = vmatprep.subr.bf16.mxu0 %v3387_v34  ;;  %v1248_v34 = vld [vmem:[%s5135_s3 + $0x318] sm:$0xff]  ;;  %v3453_v39 = vcombine.high %v1247_v31, %v1255_v33  ;;  %v3452_v44 = vcombine.low %v1247_v31, %v1255_v33  ;;  %v1383_v33 = vld [vmem:[%s5135_s3 + $0x750] sm:$0xff] }
 0x1ab   : > { %v3455_v40 = vcombine.high %v1248_v34, %v1256_v35 }
 0x1ad   : > { %2739 = vmatpush1.bf16.msra.mxu0 %v3386_v37 }
 0x1ae   : > { %2740 = vmatprep.subr.bf16.mxu0 %v3371_v38  ;;  %v1231_v38 = vld [vmem:[%s5135_s3 + $0x290] sm:$0xff] }
 0x1b1   : > { %2741 = vmatpush1.bf16.msra.mxu0 %v3370_v41  ;;  %v1239_v41 = vld [vmem:[%s5135_s3 + $0x2d0] sm:$0xff] }
 0x1b2   : > { %2742 = vmatprep.subr.bf16.mxu0 %v3355_v42  ;;  %v1232_v42 = vld [vmem:[%s5135_s3 + $0x298] sm:$0xff]  ;;  %v3436_v52 = vcombine.low %v1231_v38, %v1239_v41 }
 0x1b3   : > { %v3439_v47 = vcombine.high %v1232_v42, %v1240_v43 }
 0x1b5   : > { %2743 = vmatpush1.bf16.msra.mxu0 %v3354_v45  ;;  %v3454_v45 = vcombine.low %v1248_v34, %v1256_v35  ;;  %v1376_v34 = vld [vmem:[%s5135_s3 + $0x718] sm:$0xff] }
 0x1b6   : > { %2744 = vmatprep.subr.bf16.mxu0 %v3595_v46  ;;  %v3437_v46 = vcombine.high %v1231_v38, %v1239_v41  ;;  %v1384_v35 = vld [vmem:[%s5135_s3 + $0x758] sm:$0xff] }
 0x1b7   : > { %v3583_v41 = vcombine.high %v1376_v34, %v1384_v35 }
 0x1b9   : > { %2745 = vmatpush2.bf16.msra.mxu0 %v3594_v49  ;;  %v1223_v49 = vld [vmem:[%s5135_s3 + $0x250] sm:$0xff] }
 0x1ba   : > { %2746 = vmatprep.subr.bf16.mxu0 %v3579_v50  ;;  %v1216_v50 = vld [vmem:[%s5135_s3 + $0x218] sm:$0xff]  ;;  %v3420_v60 = vcombine.low %v1215_v48, %v1223_v49 }
 0x1bb   : > { %v3423_v55 = vcombine.high %v1216_v50, %v1224_v51 }
 0x1bd   : > { %2747 = vmatpush2.bf16.msra.mxu0 %v3578_v53  ;;  %v3438_v53 = vcombine.low %v1232_v42, %v1240_v43  ;;  %v1359_v42 = vld [vmem:[%s5135_s3 + $0x690] sm:$0xff] }
 0x1be   : > { %2748 = vmatprep.subr.bf16.mxu0 %v3563_v54  ;;  %v3421_v54 = vcombine.high %v1215_v48, %v1223_v49  ;;  %v1367_v43 = vld [vmem:[%s5135_s3 + $0x6d0] sm:$0xff] }
 0x1bf   : > { %v3565_v48 = vcombine.high %v1359_v42, %v1367_v43 }
 0x1c1   : > { %2749 = vmatpush2.bf16.msra.mxu0 %v3562_v57  ;;  %v1207_v57 = vld [vmem:[%s5135_s3 + $0x1d0] sm:$0xff] }
 0x1c2   : > { %2750 = vmatprep.subr.bf16.mxu0 %v3547_v58  ;;  %v1200_v58 = vld [vmem:[%s5135_s3 + $0x198] sm:$0xff]  ;;  %v3404_v4 = vcombine.low %v1199_v56, %v1207_v57 }
 0x1c3   : > { %v3407_v63 = vcombine.high %v1200_v58, %v1208_v59  ;;  %v3406_v5 = vcombine.low %v1200_v58, %v1208_v59  ;;  %v1327_v58 = vld [vmem:[%s5135_s3 + $0x590] sm:$0xff] }
 0x1c4   : > { %v1335_v59 = vld [vmem:[%s5135_s3 + $0x5d0] sm:$0xff] }
 0x1c5   : > { %2751 = vmatpush2.bf16.msra.mxu0 %v3546_v61  ;;  %v3422_v61 = vcombine.low %v1216_v50, %v1224_v51  ;;  %v1343_v50 = vld [vmem:[%s5135_s3 + $0x610] sm:$0xff] }
 0x1c6   : > { %2752 = vmatprep.subr.bf16.mxu0 %v3531_v62  ;;  %v3405_v62 = vcombine.high %v1199_v56, %v1207_v57  ;;  %v1351_v51 = vld [vmem:[%s5135_s3 + $0x650] sm:$0xff] }
 0x1c7   : > { %v3549_v56 = vcombine.high %v1343_v50, %v1351_v51 }
 0x1c9   : > { %2753 = vmatpush2.bf16.msra.mxu0 %v3530_v1  ;;  %v1191_v1 = vld [vmem:[%s5135_s3 + $0x150] sm:$0xff] }
 0x1ca   : > { %2754 = vmatprep.subr.bf16.mxu0 %v3515_v2  ;;  %v1184_v2 = vld [vmem:[%s5135_s3 + $0x118] sm:$0xff]  ;;  %v3389_v6 = vcombine.high %v1183_v0, %v1191_v1  ;;  %v3388_v12 = vcombine.low %v1183_v0, %v1191_v1  ;;  %v3533_v0 = vcombine.high %v1327_v58, %v1335_v59 }
 0x1cd   : > { %2755 = vmatpush2.bf16.msra.mxu0 %v3514_v3  ;;  %v1192_v3 = vld [vmem:[%s5135_s3 + $0x158] sm:$0xff] }
 0x1ce   : > { %2756 = vmatprep.subr.bf16.mxu0 %v3499_v10  ;;  %v3391_v7 = vcombine.high %v1184_v2, %v1192_v3  ;;  %v1168_v10 = vld [vmem:[%s5135_s3 + $0x98] sm:$0xff]  ;;  %v3390_v13 = vcombine.low %v1184_v2, %v1192_v3  ;;  %v1311_v2 = vld [vmem:[%s5135_s3 + $0x510] sm:$0xff] }
 0x1cf   : > { %v3375_v15 = vcombine.high %v1168_v10, %v1176_v11  ;;  %v3374_v21 = vcombine.low %v1168_v10, %v1176_v11  ;;  %v1319_v3 = vld [vmem:[%s5135_s3 + $0x550] sm:$0xff] }
 0x1d0   : > { %v1295_v10 = vld [vmem:[%s5135_s3 + $0x490] sm:$0xff] }
 0x1d1   : > { %2757 = vmatpush2.bf16.msra.mxu0 %v3498_v9  ;;  %v1175_v9 = vld [vmem:[%s5135_s3 + $0xd0] sm:$0xff] }
 0x1d2   : > { %2758 = vmatprep.subr.bf16.mxu0 %v3483_v18  ;;  %v3373_v14 = vcombine.high %v1167_v8, %v1175_v9  ;;  %v1152_v18 = vld [vmem:[%s5135_s3 + $0x18] sm:$0xff]  ;;  %v3372_v20 = vcombine.low %v1167_v8, %v1175_v9  ;;  %v3517_v8 = vcombine.high %v1311_v2, %v1319_v3  ;;  %v1303_v11 = vld [vmem:[%s5135_s3 + $0x4d0] sm:$0xff] }
 0x1d3   : > { %v3359_v23 = vcombine.high %v1152_v18, %v1160_v19 }
 0x1d5   : > { %2759 = vmatpush2.bf16.msra.mxu0 %v3482_v17  ;;  %v1159_v17 = vld [vmem:[%s5135_s3 + $0x50] sm:$0xff] }
 0x1d6   : > { %2814 = vmatprep.subr.bf16.mxu0 %v3471_v27  ;;  %v3357_v22 = vcombine.high %v1151_v16, %v1159_v17  ;;  %v1400_v27 = vld [vmem:[%s5135_s3 + $0x7d8] sm:$0xff] }
 0x258   : > { %v1138_v28 = vpop.f32.mrf.mxu0 }
 0x25a   : > { %v1140_v29 = vpop.f32.mrf.mxu0 }
 0x25c   : > { %v1142_v30 = vpop.f32.mrf.mxu0 }
 0x25d   : > { %v4430_v37 = vpack.c.bf16 %v1142_v30, %v1138_v28  ;;  %v3356_v28 = vcombine.low %v1151_v16, %v1159_v17  ;;  %v3501_v16 = vcombine.high %v1295_v10, %v1303_v11 }
 0x25e   : > { %v1144_v32 = vpop.f32.mrf.mxu0 }
 0x25f   : > { %v4428_v36 = vpack.c.bf16 %v1144_v32, %v1140_v29  ;;  %v3358_v29 = vcombine.low %v1152_v18, %v1160_v19  ;;  %v1375_v32 = vld [vmem:[%s5135_s3 + $0x710] sm:$0xff] }
 0x260   : > { %v1279_v18 = vld [vmem:[%s5135_s3 + $0x410] sm:$0xff] }
 0x261   : > { %2717 = vmatprep.mubr.bf16.mxu1 %v4428_v36  ;;  %2760 = vmatprep.mubr.bf16.mxu0 %v4428_v36  ;;  %v1287_v19 = vld [vmem:[%s5135_s3 + $0x450] sm:$0xff] }
 0x262   : > { %2718 = vmatmul.mubr.bf16.vlgmr.msra.gmra.mxu1 %v4430_v37  ;;  %2761 = vmatmul.mubr.bf16.vlgmr.msra.gmra.mxu0 %v4430_v37 }
 0x263   : > { %2772 = vmatpush1.bf16.msra.mxu1 %v3468_v25  ;;  %2815 = vmatpush1.bf16.msra.mxu0 %v3470_v26  ;;  %v1399_v25 = vld [vmem:[%s5135_s3 + $0x7d0] sm:$0xff]  ;;  %v1392_v26 = vld [vmem:[%s5135_s3 + $0x798] sm:$0xff] }
 0x264   : > { %2803 = vmatprep.mubr.bf16.mxu1 %v4428_v36  ;;  %2846 = vmatprep.mubr.bf16.mxu0 %v4428_v36  ;;  %v3597_v30 = vcombine.high %v1391_v24, %v1399_v25  ;;  %v3599_v31 = vcombine.high %v1392_v26, %v1400_v27  ;;  %v3596_v38 = vcombine.low %v1391_v24, %v1399_v25 }
 0x265   : > { %2773 = vmatprep.subr.bf16.mxu1 %v3453_v39  ;;  %2816 = vmatprep.subr.bf16.mxu0 %v3455_v40  ;;  %v3598_v39 = vcombine.low %v1392_v26, %v1400_v27  ;;  %v3581_v40 = vcombine.high %v1375_v32, %v1383_v33  ;;  %v3485_v24 = vcombine.high %v1279_v18, %v1287_v19  ;;  %v1265_v26 = vld [vmem:[%s5135_s3 + $0x3a0] sm:$0xff] }
 0x266   : > { %v1273_v27 = vld [vmem:[%s5135_s3 + $0x3e0] sm:$0xff] }
 0x267   : > { %2774 = vmatpush1.bf16.msra.mxu1 %v3452_v44  ;;  %2817 = vmatpush1.bf16.msra.mxu0 %v3454_v45  ;;  %v1360_v44 = vld [vmem:[%s5135_s3 + $0x698] sm:$0xff] }
 0x268   : > { %2775 = vmatprep.subr.bf16.mxu1 %v3437_v46  ;;  %2818 = vmatprep.subr.bf16.mxu0 %v3439_v47  ;;  %v1368_v45 = vld [vmem:[%s5135_s3 + $0x6d8] sm:$0xff]  ;;  %v3580_v46 = vcombine.low %v1375_v32, %v1383_v33  ;;  %v3582_v47 = vcombine.low %v1376_v34, %v1384_v35  ;;  %v3473_v32 = vcombine.high %v1265_v26, %v1273_v27  ;;  %v1249_v34 = vld [vmem:[%s5135_s3 + $0x320] sm:$0xff] }
 0x269   : > { %v3567_v49 = vcombine.high %v1360_v44, %v1368_v45  ;;  %v1257_v35 = vld [vmem:[%s5135_s3 + $0x360] sm:$0xff] }
 0x26b   : > { %2776 = vmatpush1.bf16.msra.mxu1 %v3436_v52  ;;  %2819 = vmatpush1.bf16.msra.mxu0 %v3438_v53  ;;  %v1344_v52 = vld [vmem:[%s5135_s3 + $0x618] sm:$0xff] }
 0x26c   : > { %2777 = vmatprep.subr.bf16.mxu1 %v3421_v54  ;;  %2820 = vmatprep.subr.bf16.mxu0 %v3423_v55  ;;  %v1352_v53 = vld [vmem:[%s5135_s3 + $0x658] sm:$0xff]  ;;  %v3564_v54 = vcombine.low %v1359_v42, %v1367_v43  ;;  %v3566_v55 = vcombine.low %v1360_v44, %v1368_v45  ;;  %v3457_v42 = vcombine.high %v1249_v34, %v1257_v35  ;;  %v1233_v44 = vld [vmem:[%s5135_s3 + $0x2a0] sm:$0xff] }
 0x26d   : > { %v3551_v57 = vcombine.high %v1344_v52, %v1352_v53  ;;  %v1241_v45 = vld [vmem:[%s5135_s3 + $0x2e0] sm:$0xff] }
 0x26f   : > { %2778 = vmatpush1.bf16.msra.mxu1 %v3420_v60  ;;  %2821 = vmatpush1.bf16.msra.mxu0 %v3422_v61  ;;  %v1328_v60 = vld [vmem:[%s5135_s3 + $0x598] sm:$0xff] }
 0x270   : > { %2779 = vmatprep.subr.bf16.mxu1 %v3405_v62  ;;  %2822 = vmatprep.subr.bf16.mxu0 %v3407_v63  ;;  %v1336_v61 = vld [vmem:[%s5135_s3 + $0x5d8] sm:$0xff]  ;;  %v3548_v62 = vcombine.low %v1343_v50, %v1351_v51  ;;  %v3550_v63 = vcombine.low %v1344_v52, %v1352_v53  ;;  %v3441_v50 = vcombine.high %v1233_v44, %v1241_v45  ;;  %v1217_v52 = vld [vmem:[%s5135_s3 + $0x220] sm:$0xff] }
 0x271   : > { %v3535_v1 = vcombine.high %v1328_v60, %v1336_v61  ;;  %v1225_v53 = vld [vmem:[%s5135_s3 + $0x260] sm:$0xff] }
 0x273   : > { %2780 = vmatpush1.bf16.msra.mxu1 %v3404_v4  ;;  %2823 = vmatpush1.bf16.msra.mxu0 %v3406_v5  ;;  %v1312_v4 = vld [vmem:[%s5135_s3 + $0x518] sm:$0xff] }
 0x274   : > { %2781 = vmatprep.subr.bf16.mxu1 %v3389_v6  ;;  %2824 = vmatprep.subr.bf16.mxu0 %v3391_v7  ;;  %v1320_v5 = vld [vmem:[%s5135_s3 + $0x558] sm:$0xff]  ;;  %v3532_v6 = vcombine.low %v1327_v58, %v1335_v59  ;;  %v3534_v7 = vcombine.low %v1328_v60, %v1336_v61  ;;  %v3425_v58 = vcombine.high %v1217_v52, %v1225_v53  ;;  %v1201_v60 = vld [vmem:[%s5135_s3 + $0x1a0] sm:$0xff] }
 0x275   : > { %v3519_v9 = vcombine.high %v1312_v4, %v1320_v5  ;;  %v1209_v61 = vld [vmem:[%s5135_s3 + $0x1e0] sm:$0xff] }
 0x277   : > { %2782 = vmatpush1.bf16.msra.mxu1 %v3388_v12  ;;  %2825 = vmatpush1.bf16.msra.mxu0 %v3390_v13  ;;  %v1296_v12 = vld [vmem:[%s5135_s3 + $0x498] sm:$0xff] }
 0x278   : > { %2783 = vmatprep.subr.bf16.mxu1 %v3373_v14  ;;  %2826 = vmatprep.subr.bf16.mxu0 %v3375_v15  ;;  %v1304_v13 = vld [vmem:[%s5135_s3 + $0x4d8] sm:$0xff]  ;;  %v3516_v14 = vcombine.low %v1311_v2, %v1319_v3  ;;  %v3518_v15 = vcombine.low %v1312_v4, %v1320_v5  ;;  %v3409_v2 = vcombine.high %v1201_v60, %v1209_v61  ;;  %v1185_v4 = vld [vmem:[%s5135_s3 + $0x120] sm:$0xff] }
 0x279   : > { %v3503_v17 = vcombine.high %v1296_v12, %v1304_v13  ;;  %v1193_v5 = vld [vmem:[%s5135_s3 + $0x160] sm:$0xff] }
 0x27b   : > { %2784 = vmatpush1.bf16.msra.mxu1 %v3372_v20  ;;  %2827 = vmatpush1.bf16.msra.mxu0 %v3374_v21  ;;  %v1280_v20 = vld [vmem:[%s5135_s3 + $0x418] sm:$0xff] }
 0x27c   : > { %2785 = vmatprep.subr.bf16.mxu1 %v3357_v22  ;;  %2828 = vmatprep.subr.bf16.mxu0 %v3359_v23  ;;  %v1288_v21 = vld [vmem:[%s5135_s3 + $0x458] sm:$0xff]  ;;  %v3500_v22 = vcombine.low %v1295_v10, %v1303_v11  ;;  %v3502_v23 = vcombine.low %v1296_v12, %v1304_v13  ;;  %v3393_v10 = vcombine.high %v1185_v4, %v1193_v5  ;;  %v1169_v12 = vld [vmem:[%s5135_s3 + $0xa0] sm:$0xff] }
 0x27d   : > { %v3487_v25 = vcombine.high %v1280_v20, %v1288_v21  ;;  %v1177_v13 = vld [vmem:[%s5135_s3 + $0xe0] sm:$0xff] }
 0x27f   : > { %2786 = vmatpush1.bf16.msra.mxu1 %v3356_v28  ;;  %2829 = vmatpush1.bf16.msra.mxu0 %v3358_v29  ;;  %v1266_v28 = vld [vmem:[%s5135_s3 + $0x3a8] sm:$0xff] }
 0x280   : > { %2787 = vmatprep.subr.bf16.mxu1 %v3597_v30  ;;  %2830 = vmatprep.subr.bf16.mxu0 %v3599_v31  ;;  %v1274_v29 = vld [vmem:[%s5135_s3 + $0x3e8] sm:$0xff]  ;;  %v3484_v30 = vcombine.low %v1279_v18, %v1287_v19  ;;  %v3486_v31 = vcombine.low %v1280_v20, %v1288_v21  ;;  %v3377_v18 = vcombine.high %v1169_v12, %v1177_v13  ;;  %v1153_v20 = vld [vmem:[%s5135_s3 + $0x20] sm:$0xff] }
 0x281   : > { %v3475_v33 = vcombine.high %v1266_v28, %v1274_v29  ;;  %v1161_v21 = vld [vmem:[%s5135_s3 + $0x60] sm:$0xff] }
 0x283   : > { %2788 = vmatpush2.bf16.msra.mxu1 %v3596_v38  ;;  %2831 = vmatpush2.bf16.msra.mxu0 %v3598_v39  ;;  %v1250_v38 = vld [vmem:[%s5135_s3 + $0x328] sm:$0xff] }
 0x284   : > { %2789 = vmatprep.subr.bf16.mxu1 %v3581_v40  ;;  %2832 = vmatprep.subr.bf16.mxu0 %v3583_v41  ;;  %v1258_v39 = vld [vmem:[%s5135_s3 + $0x368] sm:$0xff]  ;;  %v3472_v40 = vcombine.low %v1265_v26, %v1273_v27  ;;  %v3474_v41 = vcombine.low %v1266_v28, %v1274_v29  ;;  %v3361_v26 = vcombine.high %v1153_v20, %v1161_v21  ;;  %v1393_v28 = vld [vmem:[%s5135_s3 + $0x7a0] sm:$0xff] }
 0x285   : > { %v3459_v43 = vcombine.high %v1250_v38, %v1258_v39  ;;  %v1401_v29 = vld [vmem:[%s5135_s3 + $0x7e0] sm:$0xff] }
 0x287   : > { %2790 = vmatpush2.bf16.msra.mxu1 %v3580_v46  ;;  %2833 = vmatpush2.bf16.msra.mxu0 %v3582_v47  ;;  %v1234_v46 = vld [vmem:[%s5135_s3 + $0x2a8] sm:$0xff] }
 0x288   : > { %2791 = vmatprep.subr.bf16.mxu1 %v3565_v48  ;;  %2834 = vmatprep.subr.bf16.mxu0 %v3567_v49  ;;  %v1242_v47 = vld [vmem:[%s5135_s3 + $0x2e8] sm:$0xff]  ;;  %v3456_v48 = vcombine.low %v1249_v34, %v1257_v35  ;;  %v3458_v49 = vcombine.low %v1250_v38, %v1258_v39  ;;  %v3601_v34 = vcombine.high %v1393_v28, %v1401_v29  ;;  %v1377_v38 = vld [vmem:[%s5135_s3 + $0x720] sm:$0xff] }
 0x289   : > { %v3443_v51 = vcombine.high %v1234_v46, %v1242_v47  ;;  %v1385_v39 = vld [vmem:[%s5135_s3 + $0x760] sm:$0xff] }
 0x28b   : > { %2792 = vmatpush2.bf16.msra.mxu1 %v3564_v54  ;;  %2835 = vmatpush2.bf16.msra.mxu0 %v3566_v55  ;;  %v1218_v54 = vld [vmem:[%s5135_s3 + $0x228] sm:$0xff] }
 0x28c   : > { %2793 = vmatprep.subr.bf16.mxu1 %v3549_v56  ;;  %2836 = vmatprep.subr.bf16.mxu0 %v3551_v57  ;;  %v1226_v55 = vld [vmem:[%s5135_s3 + $0x268] sm:$0xff]  ;;  %v3440_v56 = vcombine.low %v1233_v44, %v1241_v45  ;;  %v3442_v57 = vcombine.low %v1234_v46, %v1242_v47  ;;  %v3585_v44 = vcombine.high %v1377_v38, %v1385_v39  ;;  %v1361_v46 = vld [vmem:[%s5135_s3 + $0x6a0] sm:$0xff] }
 0x28d   : > { %v3427_v59 = vcombine.high %v1218_v54, %v1226_v55  ;;  %v1369_v47 = vld [vmem:[%s5135_s3 + $0x6e0] sm:$0xff] }
 0x28f   : > { %2794 = vmatpush2.bf16.msra.mxu1 %v3548_v62  ;;  %2837 = vmatpush2.bf16.msra.mxu0 %v3550_v63  ;;  %v1202_v62 = vld [vmem:[%s5135_s3 + $0x1a8] sm:$0xff] }
 0x290   : > { %2795 = vmatprep.subr.bf16.mxu1 %v3533_v0  ;;  %2838 = vmatprep.subr.bf16.mxu0 %v3535_v1  ;;  %v1210_v63 = vld [vmem:[%s5135_s3 + $0x1e8] sm:$0xff]  ;;  %v3424_v0 = vcombine.low %v1217_v52, %v1225_v53  ;;  %v3426_v1 = vcombine.low %v1218_v54, %v1226_v55  ;;  %v3569_v52 = vcombine.high %v1361_v46, %v1369_v47  ;;  %v1345_v54 = vld [vmem:[%s5135_s3 + $0x620] sm:$0xff] }
 0x291   : > { %v3411_v3 = vcombine.high %v1202_v62, %v1210_v63  ;;  %v1353_v55 = vld [vmem:[%s5135_s3 + $0x660] sm:$0xff] }
 0x293   : > { %2796 = vmatpush2.bf16.msra.mxu1 %v3532_v6  ;;  %2839 = vmatpush2.bf16.msra.mxu0 %v3534_v7  ;;  %v1186_v6 = vld [vmem:[%s5135_s3 + $0x128] sm:$0xff] }
 0x294   : > { %2797 = vmatprep.subr.bf16.mxu1 %v3517_v8  ;;  %2840 = vmatprep.subr.bf16.mxu0 %v3519_v9  ;;  %v1194_v7 = vld [vmem:[%s5135_s3 + $0x168] sm:$0xff]  ;;  %v3408_v8 = vcombine.low %v1201_v60, %v1209_v61  ;;  %v3410_v9 = vcombine.low %v1202_v62, %v1210_v63  ;;  %v3553_v60 = vcombine.high %v1345_v54, %v1353_v55  ;;  %v1329_v62 = vld [vmem:[%s5135_s3 + $0x5a0] sm:$0xff] }
 0x295   : > { %v3395_v11 = vcombine.high %v1186_v6, %v1194_v7  ;;  %v1337_v63 = vld [vmem:[%s5135_s3 + $0x5e0] sm:$0xff] }
 0x297   : > { %2798 = vmatpush2.bf16.msra.mxu1 %v3516_v14  ;;  %2841 = vmatpush2.bf16.msra.mxu0 %v3518_v15  ;;  %v1170_v14 = vld [vmem:[%s5135_s3 + $0xa8] sm:$0xff] }
 0x298   : > { %2799 = vmatprep.subr.bf16.mxu1 %v3501_v16  ;;  %2842 = vmatprep.subr.bf16.mxu0 %v3503_v17  ;;  %v1178_v15 = vld [vmem:[%s5135_s3 + $0xe8] sm:$0xff]  ;;  %v3392_v16 = vcombine.low %v1185_v4, %v1193_v5  ;;  %v3394_v17 = vcombine.low %v1186_v6, %v1194_v7  ;;  %v3537_v4 = vcombine.high %v1329_v62, %v1337_v63  ;;  %v1313_v6 = vld [vmem:[%s5135_s3 + $0x520] sm:$0xff] }
 0x299   : > { %v3379_v19 = vcombine.high %v1170_v14, %v1178_v15  ;;  %v1321_v7 = vld [vmem:[%s5135_s3 + $0x560] sm:$0xff] }
 0x29b   : > { %2800 = vmatpush2.bf16.msra.mxu1 %v3500_v22  ;;  %2843 = vmatpush2.bf16.msra.mxu0 %v3502_v23  ;;  %v1154_v22 = vld [vmem:[%s5135_s3 + $0x28] sm:$0xff] }
 0x29c   : > { %2801 = vmatprep.subr.bf16.mxu1 %v3485_v24  ;;  %2844 = vmatprep.subr.bf16.mxu0 %v3487_v25  ;;  %v1162_v23 = vld [vmem:[%s5135_s3 + $0x68] sm:$0xff]  ;;  %v3376_v24 = vcombine.low %v1169_v12, %v1177_v13  ;;  %v3378_v25 = vcombine.low %v1170_v14, %v1178_v15  ;;  %v3521_v12 = vcombine.high %v1313_v6, %v1321_v7  ;;  %v1297_v14 = vld [vmem:[%s5135_s3 + $0x4a0] sm:$0xff] }
 0x29d   : > { %v3363_v27 = vcombine.high %v1154_v22, %v1162_v23  ;;  %v1305_v15 = vld [vmem:[%s5135_s3 + $0x4e0] sm:$0xff] }
 0x29f   : > { %2802 = vmatpush2.bf16.msra.mxu1 %v3484_v30  ;;  %2845 = vmatpush2.bf16.msra.mxu0 %v3486_v31  ;;  %v1394_v30 = vld [vmem:[%s5135_s3 + $0x7a8] sm:$0xff] }
 0x2a0   : > { %2857 = vmatprep.subr.bf16.mxu1 %v3473_v32  ;;  %2900 = vmatprep.subr.bf16.mxu0 %v3475_v33  ;;  %v1402_v31 = vld [vmem:[%s5135_s3 + $0x7e8] sm:$0xff]  ;;  %v3360_v32 = vcombine.low %v1153_v20, %v1161_v21  ;;  %v3362_v33 = vcombine.low %v1154_v22, %v1162_v23  ;;  %v3505_v20 = vcombine.high %v1297_v14, %v1305_v15  ;;  %v1281_v22 = vld [vmem:[%s5135_s3 + $0x420] sm:$0xff] }
 0x2a1   : > { %v3603_v35 = vcombine.high %v1394_v30, %v1402_v31  ;;  %v1289_v23 = vld [vmem:[%s5135_s3 + $0x460] sm:$0xff] }
 0x2a2   : > { %2804 = vmatmul.mubr.bf16.vlgmr.msra.gmra.mxu1 %v4430_v37  ;;  %2847 = vmatmul.mubr.bf16.vlgmr.msra.gmra.mxu0 %v4430_v37 }
 0x2a3   : > { %2858 = vmatpush1.bf16.msra.mxu1 %v3472_v40  ;;  %2889 = vmatprep.mubr.bf16.mxu1 %v4428_v36  ;;  %v1378_v40 = vld [vmem:[%s5135_s3 + $0x728] sm:$0xff] }
 0x2a4   : > { %2901 = vmatpush1.bf16.msra.mxu0 %v3474_v41  ;;  %2932 = vmatprep.mubr.bf16.mxu0 %v4428_v36  ;;  %v1386_v41 = vld [vmem:[%s5135_s3 + $0x768] sm:$0xff] }
 0x2a5   : > { %2859 = vmatprep.subr.bf16.mxu1 %v3457_v42  ;;  %2902 = vmatprep.subr.bf16.mxu0 %v3459_v43  ;;  %v3600_v42 = vcombine.low %v1393_v28, %v1401_v29  ;;  %v3602_v43 = vcombine.low %v1394_v30, %v1402_v31  ;;  %v3587_v45 = vcombine.high %v1378_v40, %v1386_v41  ;;  %v1267_v30 = vld [vmem:[%s5135_s3 + $0x3b0] sm:$0xff] }
 0x2a6   : > { %v3489_v28 = vcombine.high %v1281_v22, %v1289_v23  ;;  %v1275_v31 = vld [vmem:[%s5135_s3 + $0x3f0] sm:$0xff] }
 0x2a7   : > { %2860 = vmatpush1.bf16.msra.mxu1 %v3456_v48  ;;  %v1362_v48 = vld [vmem:[%s5135_s3 + $0x6a8] sm:$0xff] }
 0x2a8   : > { %2903 = vmatpush1.bf16.msra.mxu0 %v3458_v49  ;;  %2861 = vmatprep.subr.bf16.mxu1 %v3441_v50  ;;  %v1370_v49 = vld [vmem:[%s5135_s3 + $0x6e8] sm:$0xff]  ;;  %v3584_v50 = vcombine.low %v1377_v38, %v1385_v39  ;;  %v3477_v38 = vcombine.high %v1267_v30, %v1275_v31 }
 0x2a9   : > { %2904 = vmatprep.subr.bf16.mxu0 %v3443_v51  ;;  %v3586_v51 = vcombine.low %v1378_v40, %v1386_v41  ;;  %v3571_v53 = vcombine.high %v1362_v48, %v1370_v49  ;;  %v1251_v40 = vld [vmem:[%s5135_s3 + $0x330] sm:$0xff] }
 0x2aa   : > { %v1259_v41 = vld [vmem:[%s5135_s3 + $0x370] sm:$0xff] }
 0x2ab   : > { %2862 = vmatpush1.bf16.msra.mxu1 %v3440_v56  ;;  %v1346_v56 = vld [vmem:[%s5135_s3 + $0x628] sm:$0xff] }
 0x2ac   : > { %2905 = vmatpush1.bf16.msra.mxu0 %v3442_v57  ;;  %2863 = vmatprep.subr.bf16.mxu1 %v3425_v58  ;;  %v1354_v57 = vld [vmem:[%s5135_s3 + $0x668] sm:$0xff]  ;;  %v3568_v58 = vcombine.low %v1361_v46, %v1369_v47  ;;  %v3461_v46 = vcombine.high %v1251_v40, %v1259_v41  ;;  %v1235_v47 = vld [vmem:[%s5135_s3 + $0x2b0] sm:$0xff] }
 0x2ad   : > { %2906 = vmatprep.subr.bf16.mxu0 %v3427_v59  ;;  %v3570_v59 = vcombine.low %v1362_v48, %v1370_v49  ;;  %v3555_v61 = vcombine.high %v1346_v56, %v1354_v57  ;;  %v1243_v48 = vld [vmem:[%s5135_s3 + $0x2f0] sm:$0xff] }
 0x2af   : > { %2864 = vmatpush1.bf16.msra.mxu1 %v3424_v0  ;;  %v1330_v0 = vld [vmem:[%s5135_s3 + $0x5a8] sm:$0xff] }
 0x2b0   : > { %2907 = vmatpush1.bf16.msra.mxu0 %v3426_v1  ;;  %2865 = vmatprep.subr.bf16.mxu1 %v3409_v2  ;;  %v1338_v1 = vld [vmem:[%s5135_s3 + $0x5e8] sm:$0xff]  ;;  %v3552_v2 = vcombine.low %v1345_v54, %v1353_v55  ;;  %v3445_v54 = vcombine.high %v1235_v47, %v1243_v48 }
 0x2b1   : > { %2908 = vmatprep.subr.bf16.mxu0 %v3411_v3  ;;  %v3554_v3 = vcombine.low %v1346_v56, %v1354_v57  ;;  %v3539_v5 = vcombine.high %v1330_v0, %v1338_v1  ;;  %v1219_v56 = vld [vmem:[%s5135_s3 + $0x230] sm:$0xff] }
 0x2b2   : > { %v1227_v57 = vld [vmem:[%s5135_s3 + $0x270] sm:$0xff] }
 0x2b3   : > { %2866 = vmatpush1.bf16.msra.mxu1 %v3408_v8  ;;  %v1314_v8 = vld [vmem:[%s5135_s3 + $0x528] sm:$0xff] }
 0x2b4   : > { %2909 = vmatpush1.bf16.msra.mxu0 %v3410_v9  ;;  %2867 = vmatprep.subr.bf16.mxu1 %v3393_v10  ;;  %v1322_v9 = vld [vmem:[%s5135_s3 + $0x568] sm:$0xff]  ;;  %v3536_v10 = vcombine.low %v1329_v62, %v1337_v63  ;;  %v1203_v63 = vld [vmem:[%s5135_s3 + $0x1b0] sm:$0xff] }
 0x2b5   : > { %2910 = vmatprep.subr.bf16.mxu0 %v3395_v11  ;;  %v3538_v11 = vcombine.low %v1330_v0, %v1338_v1  ;;  %v3523_v13 = vcombine.high %v1314_v8, %v1322_v9  ;;  %v1211_v0 = vld [vmem:[%s5135_s3 + $0x1f0] sm:$0xff]  ;;  %v1204_v1 = vld [vmem:[%s5135_s3 + $0x1b8] sm:$0xff] }
 0x2b7   : > { %2868 = vmatpush1.bf16.msra.mxu1 %v3392_v16  ;;  %v1298_v16 = vld [vmem:[%s5135_s3 + $0x4a8] sm:$0xff] }
 0x2b8   : > { %2911 = vmatpush1.bf16.msra.mxu0 %v3394_v17  ;;  %2869 = vmatprep.subr.bf16.mxu1 %v3377_v18  ;;  %v1306_v17 = vld [vmem:[%s5135_s3 + $0x4e8] sm:$0xff]  ;;  %v3520_v18 = vcombine.low %v1313_v6, %v1321_v7  ;;  %v1187_v7 = vld [vmem:[%s5135_s3 + $0x130] sm:$0xff] }
 0x2b9   : > { %2912 = vmatprep.subr.bf16.mxu0 %v3379_v19  ;;  %v3522_v19 = vcombine.low %v1314_v8, %v1322_v9  ;;  %v3507_v21 = vcombine.high %v1298_v16, %v1306_v17  ;;  %v1195_v8 = vld [vmem:[%s5135_s3 + $0x170] sm:$0xff]  ;;  %v1188_v9 = vld [vmem:[%s5135_s3 + $0x138] sm:$0xff] }
 0x2bb   : > { %2870 = vmatpush1.bf16.msra.mxu1 %v3376_v24  ;;  %v1282_v24 = vld [vmem:[%s5135_s3 + $0x428] sm:$0xff] }
 0x2bc   : > { %2913 = vmatpush1.bf16.msra.mxu0 %v3378_v25  ;;  %2871 = vmatprep.subr.bf16.mxu1 %v3361_v26  ;;  %v1290_v25 = vld [vmem:[%s5135_s3 + $0x468] sm:$0xff]  ;;  %v3504_v26 = vcombine.low %v1297_v14, %v1305_v15  ;;  %v1171_v15 = vld [vmem:[%s5135_s3 + $0xb0] sm:$0xff] }
 0x2bd   : > { %2914 = vmatprep.subr.bf16.mxu0 %v3363_v27  ;;  %v3506_v27 = vcombine.low %v1298_v16, %v1306_v17  ;;  %v3491_v29 = vcombine.high %v1282_v24, %v1290_v25  ;;  %v1179_v16 = vld [vmem:[%s5135_s3 + $0xf0] sm:$0xff]  ;;  %v1172_v17 = vld [vmem:[%s5135_s3 + $0xb8] sm:$0xff] }
 0x2bf   : > { %2872 = vmatpush1.bf16.msra.mxu1 %v3360_v32  ;;  %v1268_v32 = vld [vmem:[%s5135_s3 + $0x3b8] sm:$0xff] }
 0x2c0   : > { %2915 = vmatpush1.bf16.msra.mxu0 %v3362_v33  ;;  %2873 = vmatprep.subr.bf16.mxu1 %v3601_v34  ;;  %v1276_v33 = vld [vmem:[%s5135_s3 + $0x3f8] sm:$0xff]  ;;  %v3488_v34 = vcombine.low %v1281_v22, %v1289_v23  ;;  %v1155_v23 = vld [vmem:[%s5135_s3 + $0x30] sm:$0xff] }
 0x2c1   : > { %2916 = vmatprep.subr.bf16.mxu0 %v3603_v35  ;;  %v3490_v35 = vcombine.low %v1282_v24, %v1290_v25  ;;  %v3479_v39 = vcombine.high %v1268_v32, %v1276_v33  ;;  %v1163_v24 = vld [vmem:[%s5135_s3 + $0x70] sm:$0xff]  ;;  %v1156_v25 = vld [vmem:[%s5135_s3 + $0x38] sm:$0xff] }
 0x2c3   : > { %2874 = vmatpush2.bf16.msra.mxu1 %v3600_v42  ;;  %v3476_v42 = vcombine.low %v1267_v30, %v1275_v31  ;;  %v1395_v31 = vld [vmem:[%s5135_s3 + $0x7b0] sm:$0xff] }
 0x2c4   : > { %2917 = vmatpush2.bf16.msra.mxu0 %v3602_v43  ;;  %2875 = vmatprep.subr.bf16.mxu1 %v3585_v44  ;;  %v1252_v43 = vld [vmem:[%s5135_s3 + $0x338] sm:$0xff] }
 0x2c5   : > { %2918 = vmatprep.subr.bf16.mxu0 %v3587_v45  ;;  %v1260_v44 = vld [vmem:[%s5135_s3 + $0x378] sm:$0xff]  ;;  %v3478_v45 = vcombine.low %v1268_v32, %v1276_v33  ;;  %v1403_v32 = vld [vmem:[%s5135_s3 + $0x7f0] sm:$0xff] }
 0x2c6   : > { %v3463_v49 = vcombine.high %v1252_v43, %v1260_v44  ;;  %v1396_v33 = vld [vmem:[%s5135_s3 + $0x7b8] sm:$0xff] }
 0x2c7   : > { %2876 = vmatpush2.bf16.msra.mxu1 %v3584_v50  ;;  %v1236_v50 = vld [vmem:[%s5135_s3 + $0x2b8] sm:$0xff] }
 0x2c8   : > { %2919 = vmatpush2.bf16.msra.mxu0 %v3586_v51  ;;  %2877 = vmatprep.subr.bf16.mxu1 %v3569_v52  ;;  %v1244_v51 = vld [vmem:[%s5135_s3 + $0x2f8] sm:$0xff]  ;;  %v3460_v52 = vcombine.low %v1251_v40, %v1259_v41  ;;  %v1379_v41 = vld [vmem:[%s5135_s3 + $0x730] sm:$0xff] }
 0x2c9   : > { %2920 = vmatprep.subr.bf16.mxu0 %v3571_v53  ;;  %v3462_v53 = vcombine.low %v1252_v43, %v1260_v44  ;;  %v3447_v55 = vcombine.high %v1236_v50, %v1244_v51  ;;  %v1380_v43 = vld [vmem:[%s5135_s3 + $0x738] sm:$0xff] }
 0x2ca   : > { %v1388_v44 = vld [vmem:[%s5135_s3 + $0x778] sm:$0xff] }
 0x2cb   : > { %2878 = vmatpush2.bf16.msra.mxu1 %v3568_v58  ;;  %v1220_v58 = vld [vmem:[%s5135_s3 + $0x238] sm:$0xff] }
 0x2cc   : > { %2921 = vmatpush2.bf16.msra.mxu0 %v3570_v59  ;;  %2879 = vmatprep.subr.bf16.mxu1 %v3553_v60  ;;  %v1228_v59 = vld [vmem:[%s5135_s3 + $0x278] sm:$0xff]  ;;  %v3446_v60 = vcombine.low %v1236_v50, %v1244_v51  ;;  %v1371_v50 = vld [vmem:[%s5135_s3 + $0x6f0] sm:$0xff] }
 0x2cd   : > { %2922 = vmatprep.subr.bf16.mxu0 %v3555_v61  ;;  %v3429_v61 = vcombine.high %v1219_v56, %v1227_v57  ;;  %v3431_v62 = vcombine.high %v1220_v58, %v1228_v59  ;;  %v1364_v51 = vld [vmem:[%s5135_s3 + $0x6b8] sm:$0xff] }
 0x2cf   : > { %2880 = vmatpush2.bf16.msra.mxu1 %v3552_v2  ;;  %v1212_v2 = vld [vmem:[%s5135_s3 + $0x1f8] sm:$0xff] }
 0x2d0   : > { %2923 = vmatpush2.bf16.msra.mxu0 %v3554_v3  ;;  %2881 = vmatprep.subr.bf16.mxu1 %v3537_v4  ;;  %v3428_v3 = vcombine.low %v1219_v56, %v1227_v57  ;;  %v3430_v4 = vcombine.low %v1220_v58, %v1228_v59  ;;  %v3415_v6 = vcombine.high %v1204_v1, %v1212_v2  ;;  %v1347_v57 = vld [vmem:[%s5135_s3 + $0x630] sm:$0xff]  ;;  %v1348_v59 = vld [vmem:[%s5135_s3 + $0x638] sm:$0xff] }
 0x2d1   : > { %2924 = vmatprep.subr.bf16.mxu0 %v3539_v5  ;;  %v3413_v5 = vcombine.high %v1203_v63, %v1211_v0  ;;  %v1355_v58 = vld [vmem:[%s5135_s3 + $0x670] sm:$0xff] }
 0x2d3   : > { %2882 = vmatpush2.bf16.msra.mxu1 %v3536_v10  ;;  %v1196_v10 = vld [vmem:[%s5135_s3 + $0x178] sm:$0xff] }
 0x2d4   : > { %2925 = vmatpush2.bf16.msra.mxu0 %v3538_v11  ;;  %2883 = vmatprep.subr.bf16.mxu1 %v3521_v12  ;;  %v3412_v11 = vcombine.low %v1203_v63, %v1211_v0  ;;  %v3414_v12 = vcombine.low %v1204_v1, %v1212_v2  ;;  %v3399_v14 = vcombine.high %v1188_v9, %v1196_v10  ;;  %v1331_v0 = vld [vmem:[%s5135_s3 + $0x5b0] sm:$0xff]  ;;  %v1332_v2 = vld [vmem:[%s5135_s3 + $0x5b8] sm:$0xff] }
 0x2d5   : > { %2926 = vmatprep.subr.bf16.mxu0 %v3523_v13  ;;  %v3397_v13 = vcombine.high %v1187_v7, %v1195_v8  ;;  %v1339_v1 = vld [vmem:[%s5135_s3 + $0x5f0] sm:$0xff] }
 0x2d7   : > { %2884 = vmatpush2.bf16.msra.mxu1 %v3520_v18  ;;  %v1180_v18 = vld [vmem:[%s5135_s3 + $0xf8] sm:$0xff] }
 0x2d8   : > { %2927 = vmatpush2.bf16.msra.mxu0 %v3522_v19  ;;  %2885 = vmatprep.subr.bf16.mxu1 %v3505_v20  ;;  %v3396_v19 = vcombine.low %v1187_v7, %v1195_v8  ;;  %v3398_v20 = vcombine.low %v1188_v9, %v1196_v10  ;;  %v3383_v22 = vcombine.high %v1172_v17, %v1180_v18  ;;  %v1315_v8 = vld [vmem:[%s5135_s3 + $0x530] sm:$0xff]  ;;  %v1316_v10 = vld [vmem:[%s5135_s3 + $0x538] sm:$0xff] }
 0x2d9   : > { %2928 = vmatprep.subr.bf16.mxu0 %v3507_v21  ;;  %v3381_v21 = vcombine.high %v1171_v15, %v1179_v16  ;;  %v1323_v9 = vld [vmem:[%s5135_s3 + $0x570] sm:$0xff] }
 0x2db   : > { %2886 = vmatpush2.bf16.msra.mxu1 %v3504_v26  ;;  %v1164_v26 = vld [vmem:[%s5135_s3 + $0x78] sm:$0xff] }
 0x2dc   : > { %2929 = vmatpush2.bf16.msra.mxu0 %v3506_v27  ;;  %2887 = vmatprep.subr.bf16.mxu1 %v3489_v28  ;;  %v3380_v27 = vcombine.low %v1171_v15, %v1179_v16  ;;  %v3382_v28 = vcombine.low %v1172_v17, %v1180_v18  ;;  %v3367_v30 = vcombine.high %v1156_v25, %v1164_v26  ;;  %v1299_v16 = vld [vmem:[%s5135_s3 + $0x4b0] sm:$0xff]  ;;  %v1300_v18 = vld [vmem:[%s5135_s3 + $0x4b8] sm:$0xff] }
 0x2dd   : > { %2930 = vmatprep.subr.bf16.mxu0 %v3491_v29  ;;  %v3365_v29 = vcombine.high %v1155_v23, %v1163_v24  ;;  %v1307_v17 = vld [vmem:[%s5135_s3 + $0x4f0] sm:$0xff] }
 0x2df   : > { %2888 = vmatpush2.bf16.msra.mxu1 %v3488_v34  ;;  %v1404_v34 = vld [vmem:[%s5135_s3 + $0x7f8] sm:$0xff] }
 0x2e0   : > { %2931 = vmatpush2.bf16.msra.mxu0 %v3490_v35  ;;  %2943 = vmatprep.subr.bf16.mxu1 %v3477_v38  ;;  %v3364_v35 = vcombine.low %v1155_v23, %v1163_v24  ;;  %v3366_v38 = vcombine.low %v1156_v25, %v1164_v26  ;;  %v3607_v40 = vcombine.high %v1396_v33, %v1404_v34  ;;  %v1283_v24 = vld [vmem:[%s5135_s3 + $0x430] sm:$0xff]  ;;  %v1284_v26 = vld [vmem:[%s5135_s3 + $0x438] sm:$0xff] }
 0x2e1   : > { %2986 = vmatprep.subr.bf16.mxu0 %v3479_v39  ;;  %v3605_v39 = vcombine.high %v1395_v31, %v1403_v32  ;;  %v1291_v25 = vld [vmem:[%s5135_s3 + $0x470] sm:$0xff] }
 0x2e2   : > { %2890 = vmatmul.mubr.bf16.vlgmr.msra.gmra.mxu1 %v4430_v37 }
 0x2e3   : > { %2933 = vmatmul.mubr.bf16.vlgmr.msra.gmra.mxu0 %v4430_v37  ;;  %2944 = vmatpush1.bf16.msra.mxu1 %v3476_v42  ;;  %v1387_v42 = vld [vmem:[%s5135_s3 + $0x770] sm:$0xff] }
 0x2e4   : > { %2975 = vmatprep.mubr.bf16.mxu1 %v4428_v36  ;;  %2987 = vmatpush1.bf16.msra.mxu0 %v3478_v45  ;;  %v3604_v45 = vcombine.low %v1395_v31, %v1403_v32  ;;  %v3492_v32 = vcombine.low %v1283_v24, %v1291_v25 }
 0x2e5   : > { %3018 = vmatprep.mubr.bf16.mxu0 %v4428_v36  ;;  %2945 = vmatprep.subr.bf16.mxu1 %v3461_v46  ;;  %v3444_v36 = vcombine.low %v1235_v47, %v1243_v48  ;;  %v3606_v46 = vcombine.low %v1396_v33, %v1404_v34  ;;  %v3589_v47 = vcombine.high %v1379_v41, %v1387_v42 }
 0x2e6   : > { %2988 = vmatprep.subr.bf16.mxu0 %v3463_v49  ;;  %v3591_v48 = vcombine.high %v1380_v43, %v1388_v44  ;;  %v1363_v49 = vld [vmem:[%s5135_s3 + $0x6b0] sm:$0xff] }
 0x2e7   : > { %2946 = vmatpush1.bf16.msra.mxu1 %v3460_v52  ;;  %v1372_v52 = vld [vmem:[%s5135_s3 + $0x6f8] sm:$0xff] }
 0x2e8   : > { %2989 = vmatpush1.bf16.msra.mxu0 %v3462_v53  ;;  %2947 = vmatprep.subr.bf16.mxu1 %v3445_v54  ;;  %v3588_v53 = vcombine.low %v1379_v41, %v1387_v42  ;;  %v3590_v54 = vcombine.low %v1380_v43, %v1388_v44  ;;  %v3575_v56 = vcombine.high %v1364_v51, %v1372_v52 }
 0x2e9   : > { %2990 = vmatprep.subr.bf16.mxu0 %v3447_v55  ;;  %v3573_v55 = vcombine.high %v1363_v49, %v1371_v50 }
 0x2eb   : > { %2948 = vmatpush1.bf16.msra.mxu1 %v3444_v36  ;;  %v1356_v36 = vld [vmem:[%s5135_s3 + $0x678] sm:$0xff] }
 0x2ec   : > { %2991 = vmatpush1.bf16.msra.mxu0 %v3446_v60  ;;  %2949 = vmatprep.subr.bf16.mxu1 %v3429_v61  ;;  %v3572_v60 = vcombine.low %v1363_v49, %v1371_v50  ;;  %v3574_v61 = vcombine.low %v1364_v51, %v1372_v52  ;;  %v3559_v63 = vcombine.high %v1348_v59, %v1356_v36 }
 0x2ed   : > { %2992 = vmatprep.subr.bf16.mxu0 %v3431_v62  ;;  %v3557_v62 = vcombine.high %v1347_v57, %v1355_v58 }
 0x2ef   : > { %2950 = vmatpush1.bf16.msra.mxu1 %v3428_v3  ;;  %v1340_v3 = vld [vmem:[%s5135_s3 + $0x5f8] sm:$0xff] }
 0x2f0   : > { %2993 = vmatpush1.bf16.msra.mxu0 %v3430_v4  ;;  %2951 = vmatprep.subr.bf16.mxu1 %v3413_v5  ;;  %v3556_v4 = vcombine.low %v1347_v57, %v1355_v58  ;;  %v3558_v5 = vcombine.low %v1348_v59, %v1356_v36  ;;  %v3543_v7 = vcombine.high %v1332_v2, %v1340_v3 }
 0x2f1   : > { %2994 = vmatprep.subr.bf16.mxu0 %v3415_v6  ;;  %v3541_v6 = vcombine.high %v1331_v0, %v1339_v1 }
 0x2f3   : > { %2952 = vmatpush1.bf16.msra.mxu1 %v3412_v11  ;;  %v1324_v11 = vld [vmem:[%s5135_s3 + $0x578] sm:$0xff] }
 0x2f4   : > { %2995 = vmatpush1.bf16.msra.mxu0 %v3414_v12  ;;  %2953 = vmatprep.subr.bf16.mxu1 %v3397_v13  ;;  %v3540_v12 = vcombine.low %v1331_v0, %v1339_v1  ;;  %v3542_v13 = vcombine.low %v1332_v2, %v1340_v3  ;;  %v3527_v15 = vcombine.high %v1316_v10, %v1324_v11 }
 0x2f5   : > { %2996 = vmatprep.subr.bf16.mxu0 %v3399_v14  ;;  %v3525_v14 = vcombine.high %v1315_v8, %v1323_v9 }
 0x2f7   : > { %2954 = vmatpush1.bf16.msra.mxu1 %v3396_v19  ;;  %v1308_v19 = vld [vmem:[%s5135_s3 + $0x4f8] sm:$0xff] }
 0x2f8   : > { %2997 = vmatpush1.bf16.msra.mxu0 %v3398_v20  ;;  %2955 = vmatprep.subr.bf16.mxu1 %v3381_v21  ;;  %v3524_v20 = vcombine.low %v1315_v8, %v1323_v9  ;;  %v3526_v21 = vcombine.low %v1316_v10, %v1324_v11  ;;  %v3511_v23 = vcombine.high %v1300_v18, %v1308_v19 }
 0x2f9   : > { %2998 = vmatprep.subr.bf16.mxu0 %v3383_v22  ;;  %v3509_v22 = vcombine.high %v1299_v16, %v1307_v17 }
 0x2fb   : > { %2956 = vmatpush1.bf16.msra.mxu1 %v3380_v27  ;;  %v1292_v27 = vld [vmem:[%s5135_s3 + $0x478] sm:$0xff] }
 0x2fc   : > { %2999 = vmatpush1.bf16.msra.mxu0 %v3382_v28  ;;  %2957 = vmatprep.subr.bf16.mxu1 %v3365_v29  ;;  %v3508_v28 = vcombine.low %v1299_v16, %v1307_v17  ;;  %v3510_v29 = vcombine.low %v1300_v18, %v1308_v19  ;;  %v3495_v31 = vcombine.high %v1284_v26, %v1292_v27 }
 0x2fd   : > { %3000 = vmatprep.subr.bf16.mxu0 %v3367_v30  ;;  %v3493_v30 = vcombine.high %v1283_v24, %v1291_v25  ;;  %v3494_v33 = vcombine.low %v1284_v26, %v1292_v27 }
 0x2ff   : > { %2958 = vmatpush1.bf16.msra.mxu1 %v3364_v35 }
 0x300   : > { %3001 = vmatpush1.bf16.msra.mxu0 %v3366_v38  ;;  %2959 = vmatprep.subr.bf16.mxu1 %v3605_v39 }
 0x301   : > { %3002 = vmatprep.subr.bf16.mxu0 %v3607_v40 }
 0x303   : > { %2960 = vmatpush2.bf16.msra.mxu1 %v3604_v45 }
 0x304   : > { %3003 = vmatpush2.bf16.msra.mxu0 %v3606_v46  ;;  %2961 = vmatprep.subr.bf16.mxu1 %v3589_v47 }
 0x305   : > { %3004 = vmatprep.subr.bf16.mxu0 %v3591_v48 }
 0x307   : > { %2962 = vmatpush2.bf16.msra.mxu1 %v3588_v53 }
 0x308   : > { %3005 = vmatpush2.bf16.msra.mxu0 %v3590_v54  ;;  %2963 = vmatprep.subr.bf16.mxu1 %v3573_v55 }
 0x309   : > { %3006 = vmatprep.subr.bf16.mxu0 %v3575_v56 }
 0x30b   : > { %2964 = vmatpush2.bf16.msra.mxu1 %v3572_v60 }
 0x30c   : > { %3007 = vmatpush2.bf16.msra.mxu0 %v3574_v61  ;;  %2965 = vmatprep.subr.bf16.mxu1 %v3557_v62 }
 0x30d   : > { %3008 = vmatprep.subr.bf16.mxu0 %v3559_v63 }
 0x30f   : > { %2966 = vmatpush2.bf16.msra.mxu1 %v3556_v4 }
 0x310   : > { %3009 = vmatpush2.bf16.msra.mxu0 %v3558_v5  ;;  %2967 = vmatprep.subr.bf16.mxu1 %v3541_v6 }
 0x311   : > { %3010 = vmatprep.subr.bf16.mxu0 %v3543_v7 }
 0x313   : > { %2968 = vmatpush2.bf16.msra.mxu1 %v3540_v12 }
 0x314   : > { %3011 = vmatpush2.bf16.msra.mxu0 %v3542_v13  ;;  %2969 = vmatprep.subr.bf16.mxu1 %v3525_v14 }
 0x315   : > { %3012 = vmatprep.subr.bf16.mxu0 %v3527_v15 }
 0x317   : > { %2970 = vmatpush2.bf16.msra.mxu1 %v3524_v20 }
 0x318   : > { %3013 = vmatpush2.bf16.msra.mxu0 %v3526_v21  ;;  %2971 = vmatprep.subr.bf16.mxu1 %v3509_v22 }
 0x319   : > { %3014 = vmatprep.subr.bf16.mxu0 %v3511_v23 }
 0x31b   : > { %2972 = vmatpush2.bf16.msra.mxu1 %v3508_v28 }
 0x31c   : > { %3015 = vmatpush2.bf16.msra.mxu0 %v3510_v29  ;;  %2973 = vmatprep.subr.bf16.mxu1 %v3493_v30 }
 0x31d   : > { %3016 = vmatprep.subr.bf16.mxu0 %v3495_v31 }
 0x31f   : > { %2974 = vmatpush2.bf16.msra.mxu1 %v3492_v32 }
 0x320   : > { %3017 = vmatpush2.bf16.msra.mxu0 %v3494_v33 }
 0x322   : > { %2976 = vmatmul.mubr.bf16.vlgmr.msra.gmra.mxu1 %v4430_v37  ;;  %v2719_v34 = vpop.f32.mrf.mxu1  ;;  %v2762_v35 = vpop.f32.mrf.mxu0 }
 0x323   : > { %3019 = vmatmul.mubr.bf16.vlgmr.msra.gmra.mxu0 %v4430_v37  ;;  %3029 = vst [vmem:[%s4101_s14] sm:$0xff] %v2719_v34  ;;  %3031 = vst [vmem:[%s4101_s14 + $0x10] sm:$0xff] %v2762_v35 }
 0x324   : > { %v2721_v38 = vpop.f32.mrf.mxu1  ;;  %v2764_v39 = vpop.f32.mrf.mxu0 }
 0x325   : > { %3030 = vst [vmem:[%s4101_s14 + $0x8] sm:$0xff] %v2721_v38  ;;  %3032 = vst [vmem:[%s4101_s14 + $0x18] sm:$0xff] %v2764_v39 }
 0x326   : > { %v2723_v40 = vpop.f32.mrf.mxu1  ;;  %v2766_v41 = vpop.f32.mrf.mxu0 }
 0x327   : > { %3045 = vst [vmem:[%s4101_s14 + $0x80] sm:$0x3] %v2723_v40  ;;  %3047 = vst [vmem:[%s4101_s14 + $0x90] sm:$0x3] %v2766_v41 }
 0x328   : > { %v2725_v42 = vpop.f32.mrf.mxu1  ;;  %v2768_v43 = vpop.f32.mrf.mxu0 }
 0x329   : > { %3046 = vst [vmem:[%s4101_s14 + $0x88] sm:$0x3] %v2725_v42  ;;  %3048 = vst [vmem:[%s4101_s14 + $0x98] sm:$0x3] %v2768_v43 }
 0x32a   : > { %v3085_v2 = vld [vmem:[%s4101_s14] sm:$0xff] (%p4007_p9)  ;;  %v3089_v4 = vld [vmem:[%s4101_s14 + $0x10] sm:$0xff] (%p4007_p9) }
 0x32b   : > { %3086 = vst [vmem:[%s5048_s10] sm:$0xff] (%p4007_p9), %v3085_v2  ;;  %3090 = vst [vmem:[%s5048_s10 + $0x10] sm:$0xff] (%p4007_p9), %v3089_v4 }
 0x32c   : > { %v3087_v3 = vld [vmem:[%s4101_s14 + $0x8] sm:$0xff] (%p4007_p9)  ;;  %v3091_v5 = vld [vmem:[%s4101_s14 + $0x18] sm:$0xff] (%p4007_p9) }
 0x32d   : > { %3088 = vst [vmem:[%s5048_s10 + $0x8] sm:$0xff] (%p4007_p9), %v3087_v3  ;;  %3092 = vst [vmem:[%s5048_s10 + $0x18] sm:$0xff] (%p4007_p9), %v3091_v5 }
 0x32e   : > { %v3117_v18 = vld [vmem:[%s4101_s14 + $0x80] sm:$0xff] (%p4007_p9)  ;;  %v3121_v20 = vld [vmem:[%s4101_s14 + $0x90] sm:$0xff] (%p4007_p9) }
 0x32f   : > { %3118 = vst [vmem:[%s5048_s10 + $0x400] sm:$0xff] (%p4007_p9), %v3117_v18  ;;  %3122 = vst [vmem:[%s5048_s10 + $0x410] sm:$0xff] (%p4007_p9), %v3121_v20 }
 0x330   : > { %v3119_v19 = vld [vmem:[%s4101_s14 + $0x88] sm:$0xff] (%p4007_p9)  ;;  %v3123_v21 = vld [vmem:[%s4101_s14 + $0x98] sm:$0xff] (%p4007_p9) }
 0x331   : > { %3120 = vst [vmem:[%s5048_s10 + $0x408] sm:$0xff] (%p4007_p9), %v3119_v19  ;;  %3124 = vst [vmem:[%s5048_s10 + $0x418] sm:$0xff] (%p4007_p9), %v3123_v21 }
 0x362   : > { %v2805_v37 = vpop.f32.mrf.mxu1  ;;  %v2848_v44 = vpop.f32.mrf.mxu0 }
 0x363   : > { %3033 = vst [vmem:[%s4101_s14 + $0x20] sm:$0xff] %v2805_v37  ;;  %3035 = vst [vmem:[%s4101_s14 + $0x30] sm:$0xff] %v2848_v44 }
 0x364   : > { %v2807_v45 = vpop.f32.mrf.mxu1  ;;  %v2850_v46 = vpop.f32.mrf.mxu0 }
 0x365   : > { %3034 = vst [vmem:[%s4101_s14 + $0x28] sm:$0xff] %v2807_v45  ;;  %3036 = vst [vmem:[%s4101_s14 + $0x38] sm:$0xff] %v2850_v46 }
 0x366   : > { %v2809_v47 = vpop.f32.mrf.mxu1  ;;  %v2852_v48 = vpop.f32.mrf.mxu0 }
 0x367   : > { %3049 = vst [vmem:[%s4101_s14 + $0xa0] sm:$0x3] %v2809_v47  ;;  %3051 = vst [vmem:[%s4101_s14 + $0xb0] sm:$0x3] %v2852_v48 }
 0x368   : > { %v2811_v49 = vpop.f32.mrf.mxu1  ;;  %v2854_v50 = vpop.f32.mrf.mxu0 }
 0x369   : > { %3050 = vst [vmem:[%s4101_s14 + $0xa8] sm:$0x3] %v2811_v49  ;;  %3052 = vst [vmem:[%s4101_s14 + $0xb8] sm:$0x3] %v2854_v50 }
 0x36a   : > { %v3093_v6 = vld [vmem:[%s4101_s14 + $0x20] sm:$0xff] (%p4007_p9)  ;;  %v3097_v8 = vld [vmem:[%s4101_s14 + $0x30] sm:$0xff] (%p4007_p9) }
 0x36b   : > { %3094 = vst [vmem:[%s5048_s10 + $0x20] sm:$0xff] (%p4007_p9), %v3093_v6  ;;  %3098 = vst [vmem:[%s5048_s10 + $0x30] sm:$0xff] (%p4007_p9), %v3097_v8 }
 0x36c   : > { %v3095_v7 = vld [vmem:[%s4101_s14 + $0x28] sm:$0xff] (%p4007_p9)  ;;  %v3099_v9 = vld [vmem:[%s4101_s14 + $0x38] sm:$0xff] (%p4007_p9) }
 0x36d   : > { %3096 = vst [vmem:[%s5048_s10 + $0x28] sm:$0xff] (%p4007_p9), %v3095_v7  ;;  %3100 = vst [vmem:[%s5048_s10 + $0x38] sm:$0xff] (%p4007_p9), %v3099_v9 }
 0x36e   : > { %v3125_v22 = vld [vmem:[%s4101_s14 + $0xa0] sm:$0xff] (%p4007_p9)  ;;  %v3129_v24 = vld [vmem:[%s4101_s14 + $0xb0] sm:$0xff] (%p4007_p9) }
 0x36f   : > { %3126 = vst [vmem:[%s5048_s10 + $0x420] sm:$0xff] (%p4007_p9), %v3125_v22  ;;  %3130 = vst [vmem:[%s5048_s10 + $0x430] sm:$0xff] (%p4007_p9), %v3129_v24 }
 0x370   : > { %v3127_v23 = vld [vmem:[%s4101_s14 + $0xa8] sm:$0xff] (%p4007_p9)  ;;  %v3131_v25 = vld [vmem:[%s4101_s14 + $0xb8] sm:$0xff] (%p4007_p9) }
 0x371   : > { %3128 = vst [vmem:[%s5048_s10 + $0x428] sm:$0xff] (%p4007_p9), %v3127_v23  ;;  %3132 = vst [vmem:[%s5048_s10 + $0x438] sm:$0xff] (%p4007_p9), %v3131_v25 }
 0x3a2   : > { %v2891_v51 = vpop.f32.mrf.mxu1 }
 0x3a3   : > { %3037 = vst [vmem:[%s4101_s14 + $0x40] sm:$0xff] %v2891_v51  ;;  %v2934_v52 = vpop.f32.mrf.mxu0 }
 0x3a4   : > { %3039 = vst [vmem:[%s4101_s14 + $0x50] sm:$0xff] %v2934_v52  ;;  %v2893_v53 = vpop.f32.mrf.mxu1 }
 0x3a5   : > { %3038 = vst [vmem:[%s4101_s14 + $0x48] sm:$0xff] %v2893_v53  ;;  %v2936_v54 = vpop.f32.mrf.mxu0 }
 0x3a6   : > { %3040 = vst [vmem:[%s4101_s14 + $0x58] sm:$0xff] %v2936_v54  ;;  %v2895_v55 = vpop.f32.mrf.mxu1 }
 0x3a7   : > { %3053 = vst [vmem:[%s4101_s14 + $0xc0] sm:$0x3] %v2895_v55  ;;  %v2938_v56 = vpop.f32.mrf.mxu0 }
 0x3a8   : > { %3055 = vst [vmem:[%s4101_s14 + $0xd0] sm:$0x3] %v2938_v56  ;;  %v2897_v57 = vpop.f32.mrf.mxu1 }
 0x3a9   : > { %3054 = vst [vmem:[%s4101_s14 + $0xc8] sm:$0x3] %v2897_v57  ;;  %v2940_v58 = vpop.f32.mrf.mxu0 }
 0x3aa   : > { %3056 = vst [vmem:[%s4101_s14 + $0xd8] sm:$0x3] %v2940_v58  ;;  %v3101_v10 = vld [vmem:[%s4101_s14 + $0x40] sm:$0xff] (%p4007_p9) }
 0x3ab   : > { %v3105_v12 = vld [vmem:[%s4101_s14 + $0x50] sm:$0xff] (%p4007_p9)  ;;  %3102 = vst [vmem:[%s5048_s10 + $0x40] sm:$0xff] (%p4007_p9), %v3101_v10 }
 0x3ac   : > { %v3103_v11 = vld [vmem:[%s4101_s14 + $0x48] sm:$0xff] (%p4007_p9)  ;;  %3106 = vst [vmem:[%s5048_s10 + $0x50] sm:$0xff] (%p4007_p9), %v3105_v12 }
 0x3ad   : > { %v3107_v13 = vld [vmem:[%s4101_s14 + $0x58] sm:$0xff] (%p4007_p9)  ;;  %3104 = vst [vmem:[%s5048_s10 + $0x48] sm:$0xff] (%p4007_p9), %v3103_v11 }
 0x3ae   : > { %3108 = vst [vmem:[%s5048_s10 + $0x58] sm:$0xff] (%p4007_p9), %v3107_v13  ;;  %v3133_v26 = vld [vmem:[%s4101_s14 + $0xc0] sm:$0xff] (%p4007_p9) }
 0x3af   : > { %v3137_v28 = vld [vmem:[%s4101_s14 + $0xd0] sm:$0xff] (%p4007_p9)  ;;  %3134 = vst [vmem:[%s5048_s10 + $0x440] sm:$0xff] (%p4007_p9), %v3133_v26 }
 0x3b0   : > { %v3135_v27 = vld [vmem:[%s4101_s14 + $0xc8] sm:$0xff] (%p4007_p9)  ;;  %3138 = vst [vmem:[%s5048_s10 + $0x450] sm:$0xff] (%p4007_p9), %v3137_v28 }
 0x3b1   : > { %3136 = vst [vmem:[%s5048_s10 + $0x448] sm:$0xff] (%p4007_p9), %v3135_v27  ;;  %v3139_v29 = vld [vmem:[%s4101_s14 + $0xd8] sm:$0xff] (%p4007_p9) }
 0x3b2   : > { %3140 = vst [vmem:[%s5048_s10 + $0x458] sm:$0xff] (%p4007_p9), %v3139_v29 }
 0x3e2   : > { %v2977_v59 = vpop.f32.mrf.mxu1 }
 0x3e3   : > { %3041 = vst [vmem:[%s4101_s14 + $0x60] sm:$0xff] %v2977_v59  ;;  %v3020_v36 = vpop.f32.mrf.mxu0 }
 0x3e4   : > { %3043 = vst [vmem:[%s4101_s14 + $0x70] sm:$0xff] %v3020_v36  ;;  %v2979_v60 = vpop.f32.mrf.mxu1 }
 0x3e5   : > { %3042 = vst [vmem:[%s4101_s14 + $0x68] sm:$0xff] %v2979_v60  ;;  %v3022_v61 = vpop.f32.mrf.mxu0 }
 0x3e6   : > { %3044 = vst [vmem:[%s4101_s14 + $0x78] sm:$0xff] %v3022_v61  ;;  %v2981_v62 = vpop.f32.mrf.mxu1  ;;  %3067 = sbr.rel (!%p4007_p9) target bundleno = 1011 (0x3f3), region = 82 }
 0x3e7   : > { %3057 = vst [vmem:[%s4101_s14 + $0xe0] sm:$0x3] %v2981_v62  ;;  %v3024_v63 = vpop.f32.mrf.mxu0 }
 0x3e8   : > { %3059 = vst [vmem:[%s4101_s14 + $0xf0] sm:$0x3] %v3024_v63  ;;  %v2983_v0 = vpop.f32.mrf.mxu1 }
 0x3e9   : > { %3058 = vst [vmem:[%s4101_s14 + $0xe8] sm:$0x3] %v2983_v0  ;;  %v3026_v1 = vpop.f32.mrf.mxu0 }
 0x3ea   : > { %3060 = vst [vmem:[%s4101_s14 + $0xf8] sm:$0x3] %v3026_v1  ;;  %v3109_v14 = vld [vmem:[%s4101_s14 + $0x60] sm:$0xff] (%p4007_p9) }
 0x3eb   : > { %v3113_v16 = vld [vmem:[%s4101_s14 + $0x70] sm:$0xff]  ;;  %3110 = vst [vmem:[%s5048_s10 + $0x60] sm:$0xff] %v3109_v14 }
 0x3ec   : > { %v3111_v15 = vld [vmem:[%s4101_s14 + $0x68] sm:$0xff]  ;;  %3114 = vst [vmem:[%s5048_s10 + $0x70] sm:$0xff] %v3113_v16 }
 0x3ed   : > { %3112 = vst [vmem:[%s5048_s10 + $0x68] sm:$0xff] %v3111_v15  ;;  %v3115_v17 = vld [vmem:[%s4101_s14 + $0x78] sm:$0xff] }
 0x3ee   : > { %3116 = vst [vmem:[%s5048_s10 + $0x78] sm:$0xff] %v3115_v17  ;;  %v3141_v30 = vld [vmem:[%s4101_s14 + $0xe0] sm:$0xff] }
 0x3ef   : > { %3142 = vst [vmem:[%s5048_s10 + $0x460] sm:$0xff] %v3141_v30  ;;  %v3145_v32 = vld [vmem:[%s4101_s14 + $0xf0] sm:$0xff] }
 0x3f0   : > { %v3143_v31 = vld [vmem:[%s4101_s14 + $0xe8] sm:$0xff]  ;;  %3146 = vst [vmem:[%s5048_s10 + $0x470] sm:$0xff] %v3145_v32 }
 0x3f1   : > { %3144 = vst [vmem:[%s5048_s10 + $0x468] sm:$0xff] %v3143_v31  ;;  %v3147_v33 = vld [vmem:[%s4101_s14 + $0xf8] sm:$0xff] }
 0x3f2   : > { %3148 = vst [vmem:[%s5048_s10 + $0x478] sm:$0xff] %v3147_v33 }
 0x3f3 PF: > { %s14_s23 = sadd.s32 1, %s3913_s23   ;;  %s5138_s15 = smov %s3885_s16 }
 0x3f4   : > { %p11_p2 = scmp.ge.s32.totalorder %s14_s23, 18   ;;  %s5139_s16 = smov %s4012_s8 }
 0x3f5   : > { %s5140_s17 = smov %s3893_s18  ;;  %s5141_s18 = smov %s4001_s30 }
 0x3f6   : > { %s5142_s19 = smov %s3905_s21  ;;  %s5143_s20 = smov %s3909_s22 }
 0x3f7   : > { %s5144_s21 = smov %s5147_s25  ;;  %s5145_s22 = smov %s5151_s26 }
 0x3f8   :  { %13 = sbr.rel (!%p11_p2) target bundleno = 5 (0x5), region = 139 }

</bundles_post_ra>
